<compile_context>
chip_gen: v5e
topology: v5e:2x2
jax: 0.10.0
libtpu: 0.0.40
codegen_flags: <defaults>
</compile_context>

<pallas_src>
import functools

import jax
import jax.numpy as jnp
from jax.experimental import pallas as pl
from jax.experimental.pallas import tpu as pltpu

NA_PAD = 128  # lane-dense padded action dimension


def _round_up(x, m):
    return -(-x // m) * m


def actor_kernel(x_ref, w1_ref, b1_ref, w2_ref, b2_ref, w3_ref, b3_ref, o_ref,
                 *, n_actions):
    # f32 -> bf16 cast fused into the kernel (VPU work, hidden under the MXU), so the
    # wrapper never makes a separate HBM pass just to convert activation dtype.
    x = x_ref[...].astype(jnp.bfloat16)
    # fc1 + relu  (bf16 MXU inputs, f32 accumulation)
    h1 = jnp.dot(x, w1_ref[...], preferred_element_type=jnp.float32)
    h1 = jnp.maximum(h1 + b1_ref[...], 0.0).astype(jnp.bfloat16)
    # fc2 + relu
    h2 = jnp.dot(h1, w2_ref[...], preferred_element_type=jnp.float32)
    h2 = jnp.maximum(h2 + b2_ref[...], 0.0).astype(jnp.bfloat16)
    # action_probs (padded to 128 output lanes) + masked softmax over the real actions
    logits = jnp.dot(h2, w3_ref[...], preferred_element_type=jnp.float32) + b3_ref[...]
    col = jax.lax.broadcasted_iota(jnp.int32, logits.shape, 1)
    logits = jnp.where(col < n_actions, logits, jnp.float32(-1e30))
    m = jnp.max(logits, axis=-1, keepdims=True)
    e = jnp.exp(logits - m)
    denom = jnp.sum(e, axis=-1, keepdims=True)
    # Exact divide (not approx reciprocal): rows sum to 1 to f32 precision, which the
    # SAC log-prob math downstream relies on.
    o_ref[...] = (e / denom).astype(o_ref.dtype)


def prepare_params(params_f32, na_pad=NA_PAD):
    """Convert f32 (in,out) torch-style params into kernel layout:
    bf16 weights, f32 biases, final layer zero-padded to na_pad output columns."""
    # TODO(synk): optional int8 weight quantization for v5e/v6e (fp8 on v7x) to halve
    # the weight DMA that dominates small-batch latency; kept bf16 here for portability.
    w1, b1, w2, b2, w3, b3 = params_f32
    fc2, na = w3.shape
    w3p = jnp.zeros((fc2, na_pad), jnp.float32).at[:, :na].set(w3)
    b3p = jnp.zeros((1, na_pad), jnp.float32).at[:, :na].set(b3)
    return (w1.astype(jnp.bfloat16), b1.astype(jnp.float32),
            w2.astype(jnp.bfloat16), b2.astype(jnp.float32),
            w3p.astype(jnp.bfloat16), b3p.astype(jnp.float32))


def actor_forward(state_nchw, kernel_params, *, n_actions, out_dtype=jnp.float32):
    """state_nchw: (B, 3, H, W) float32 -> action probs (B, n_actions) in out_dtype."""
    w1, b1, w2, b2, w3p, b3p = kernel_params
    in_dim, fc1 = w1.shape
    fc2 = w2.shape[1]
    na_pad = w3p.shape[1]

    B = state_nchw.shape[0]
    # flatten(start_dim=1); stays f32 -- the bf16 cast happens inside the kernel.
    x = state_nchw.reshape(B, -1)

    # --- batch tiling --------------------------------------------------------
    # Target 256-row tiles (one 256-row MXU pass on v6e/v7x), 512 for very large
    # batches.  Force >=2 grid steps once B >= 256 so ("parallel",) semantics can
    # shard the batch across v7x's two TensorCores.
    target_tm = 512 if B >= 2048 else 256
    n_tiles = max(1, -(-B // target_tm))
    if n_tiles == 1 and B >= 256:
        n_tiles = 2
    tm = _round_up(-(-B // n_tiles), 8)
    bp = tm * n_tiles
    if bp != B:
        x = jnp.pad(x, ((0, bp - B), (0, 0)))

    out_itemsize = jnp.dtype(out_dtype).itemsize
    flops = 2 * bp * (in_dim * fc1 + fc1 * fc2 + fc2 * na_pad)
    transcendentals = bp * na_pad  # exp in softmax
    bytes_accessed = (x.size * 4
                      + (w1.size + w2.size + w3p.size) * 2
                      + (b1.size + b2.size + b3p.size) * 4
                      + bp * na_pad * out_itemsize)
    cost = pl.CostEstimate(flops=flops, transcendentals=transcendentals,
                           bytes_accessed=bytes_accessed)

    kernel = functools.partial(actor_kernel, n_actions=n_actions)
    out_shape = jax.ShapeDtypeStruct((bp, na_pad), out_dtype)

    if n_tiles == 1:
        # Small batch (the common SAC action-selection case): single invocation with
        # whole arrays resident in VMEM -- skips the pipeline prologue/epilogue and
        # revolving-buffer bookkeeping of a 1-step grid.
        vmem_spec = pl.BlockSpec(memory_space=pltpu.MemorySpace.VMEM)
        out = pl.pallas_call(
            kernel,
            out_shape=out_shape,
            in_specs=[vmem_spec] * 7,
            out_specs=vmem_spec,
            cost_estimate=cost,
        )(x, w1, b1, w2, b2, w3p, b3p)
        return out[:B, :n_actions]

    # Large batch: batch-tiled, pipelined grid.  Weights/biases have a constant
    # index_map and never change across steps, so keep them single-buffered.
    const = pl.Buffered(1)
    # Explicit scoped-VMEM budget: double-buffered x/out tiles, single-buffered
    # weights/biases, plus headroom for bf16/f32 intermediates (keeps v5e's 16 MiB
    # default happy even at tm=512).
    vmem_bytes = (2 * tm * in_dim * 4
                  + 2 * tm * na_pad * out_itemsize
                  + (w1.size + w2.size + w3p.size) * 2
                  + (b1.size + b2.size + b3p.size) * 4
                  + 6 * tm * max(fc1, fc2, na_pad) * 4)
    vmem_limit = int(min(100 << 20, max(16 << 20, 2 * vmem_bytes)))

    out = pl.pallas_call(
        kernel,
        out_shape=out_shape,
        grid_spec=pltpu.PrefetchScalarGridSpec(
            num_scalar_prefetch=0,
            grid=(n_tiles,),
            in_specs=[
                pl.BlockSpec((tm, in_dim), lambda i: (i, 0)),                        # x tile (f32)
                pl.BlockSpec((in_dim, fc1), lambda i: (0, 0), pipeline_mode=const),  # w1 (resident)
                pl.BlockSpec((1, fc1), lambda i: (0, 0), pipeline_mode=const),       # b1
                pl.BlockSpec((fc1, fc2), lambda i: (0, 0), pipeline_mode=const),     # w2
                pl.BlockSpec((1, fc2), lambda i: (0, 0), pipeline_mode=const),       # b2
                pl.BlockSpec((fc2, na_pad), lambda i: (0, 0), pipeline_mode=const),  # w3 (padded)
                pl.BlockSpec((1, na_pad), lambda i: (0, 0), pipeline_mode=const),    # b3 (padded)
            ],
            out_specs=pl.BlockSpec((tm, na_pad), lambda i: (i, 0)),
        ),
        compiler_params=pltpu.CompilerParams(
            dimension_semantics=("parallel",),
            vmem_limit_bytes=vmem_limit),
        cost_estimate=cost,
    )(x, w1, b1, w2, b2, w3p, b3p)

    return out[:B, :n_actions]


def init_params(key, in_dim, fc1_dims, fc2_dims, n_actions):
    """Deterministic init mimicking torch.nn.Linear default (uniform +-1/sqrt(fan_in)).
    Weights stored as (in, out) so x @ W + b == torch x @ W.T + b. Returned in f32."""
    ks = jax.random.split(key, 6)

    def lin(kw, kb, fan_in, fan_out):
        bound = 1.0 / jnp.sqrt(jnp.float32(fan_in))
        w = jax.random.uniform(kw, (fan_in, fan_out), jnp.float32, -bound, bound)
        b = jax.random.uniform(kb, (1, fan_out), jnp.float32, -bound, bound)
        return w, b

    w1, b1 = lin(ks[0], ks[1], in_dim, fc1_dims)
    w2, b2 = lin(ks[2], ks[3], fc1_dims, fc2_dims)
    w3, b3 = lin(ks[4], ks[5], fc2_dims, n_actions)
    return (w1, b1, w2, b2, w3, b3)


if __name__ == "__main__":
    # Shapes consistent with the module: 16x16 image, 3 channels, batch 2.
    B, C, H, W = 2, 3, 16, 16
    fc1_dims, fc2_dims, n_actions = 256, 512, 4
    in_dim = H * W * 3

    key = jax.random.PRNGKey(0)
    k_x, k_p, k_x2 = jax.random.split(key, 3)
    state = jax.random.normal(k_x, (B, C, H, W), dtype=jnp.float32)
    params_f32 = init_params(k_p, in_dim, fc1_dims, fc2_dims, n_actions)
    kparams = prepare_params(params_f32)

    # References -------------------------------------------------------------
    def ref_bf16_fn(x32):  # same bf16-in / f32-accumulate math as the kernel
        w1, b1, w2, b2, w3, b3 = params_f32
        xb = x32.astype(jnp.bfloat16)
        h1 = jnp.maximum(
            jnp.dot(xb, w1.astype(jnp.bfloat16), preferred_element_type=jnp.float32) + b1,
            0.0).astype(jnp.bfloat16)
        h2 = jnp.maximum(
            jnp.dot(h1, w2.astype(jnp.bfloat16), preferred_element_type=jnp.float32) + b2,
            0.0).astype(jnp.bfloat16)
        logits = jnp.dot(h2, w3.astype(jnp.bfloat16), preferred_element_type=jnp.float32) + b3
        return jax.nn.softmax(logits, axis=1)

    def ref_f32_fn(x32):  # exact f32 PyTorch-module semantics
        w1, b1, w2, b2, w3, b3 = params_f32
        h1f = jnp.maximum(x32 @ w1 + b1, 0.0)
        h2f = jnp.maximum(h1f @ w2 + b2, 0.0)
        return jax.nn.softmax(h2f @ w3 + b3, axis=1)

    # Small-batch path (grid-less, whole-array VMEM) ---------------------------
    probs = jax.block_until_ready(actor_forward(state, kparams, n_actions=n_actions))
    x32 = state.reshape(B, -1)
    assert probs.shape == (B, n_actions)
    assert jnp.allclose(probs, ref_bf16_fn(x32), atol=2e-3, rtol=2e-3)
    assert jnp.allclose(probs, ref_f32_fn(x32), atol=5e-2, rtol=5e-2)
    assert jnp.allclose(jnp.sum(probs, axis=1), 1.0, atol=1e-5)

    # Batch-tiled pipelined path (>=2 grid steps, parallel axis) --------------
    B2 = 384
    state2 = jax.random.normal(k_x2, (B2, C, H, W), dtype=jnp.float32)
    probs2 = jax.block_until_ready(actor_forward(state2, kparams, n_actions=n_actions))
    x2 = state2.reshape(B2, -1)
    assert probs2.shape == (B2, n_actions)
    assert jnp.allclose(probs2, ref_bf16_fn(x2), atol=2e-3, rtol=2e-3)
    assert jnp.allclose(jnp.sum(probs2, axis=1), 1.0, atol=1e-5)

    print("KERNEL_OK")
</pallas_src>

<mosaic_0001>
module attributes {stable_mosaic.version = 11 : i64} {
  func.func @actor_kernel(%arg0: memref<8x768xf32, #tpu.memory_space<vmem>>, %arg1: memref<768x256xbf16, #tpu.memory_space<vmem>>, %arg2: memref<1x256xf32, #tpu.memory_space<vmem>>, %arg3: memref<256x512xbf16, #tpu.memory_space<vmem>>, %arg4: memref<1x512xf32, #tpu.memory_space<vmem>>, %arg5: memref<512x128xbf16, #tpu.memory_space<vmem>>, %arg6: memref<1x128xf32, #tpu.memory_space<vmem>>, %arg7: memref<8x128xf32, #tpu.memory_space<vmem>>) attributes {dimension_semantics = [], scalar_prefetch = 0 : i64, scratch_operands = 0 : i64, tpu.core_type = #tpu.core_type<tc>} {
    %c0 = arith.constant 0 : index
    %c0_0 = arith.constant 0 : index
    %0 = vector.load %arg0[%c0, %c0_0] : memref<8x768xf32, #tpu.memory_space<vmem>>, vector<8x768xf32>
    %1 = arith.truncf %0 : vector<8x768xf32> to vector<8x768xbf16>
    %c0_1 = arith.constant 0 : index
    %c0_2 = arith.constant 0 : index
    %2 = vector.load %arg1[%c0_1, %c0_2] : memref<768x256xbf16, #tpu.memory_space<vmem>>, vector<768x256xbf16>
    %cst = arith.constant dense<0.000000e+00> : vector<8x256xf32>
    %3 = tpu.matmul %1, %2, %cst {dimension_numbers = #tpu.dot_dimension_numbers<[1], [0], [0], [1], [0, 0, 1, 1], [], []>} : vector<8x768xbf16>, vector<768x256xbf16>, vector<8x256xf32> -> vector<8x256xf32>
    %c0_3 = arith.constant 0 : index
    %c0_4 = arith.constant 0 : index
    %4 = vector.load %arg2[%c0_3, %c0_4] : memref<1x256xf32, #tpu.memory_space<vmem>>, vector<1x256xf32>
    %5 = vector.broadcast %4 : vector<1x256xf32> to vector<8x256xf32>
    %6 = arith.addf %3, %5 : vector<8x256xf32>
    %cst_5 = arith.constant 0.000000e+00 : f32
    %7 = vector.broadcast %cst_5 : f32 to vector<8x256xf32>
    %8 = arith.maximumf %6, %7 : vector<8x256xf32>
    %9 = arith.truncf %8 : vector<8x256xf32> to vector<8x256xbf16>
    %c0_6 = arith.constant 0 : index
    %c0_7 = arith.constant 0 : index
    %10 = vector.load %arg3[%c0_6, %c0_7] : memref<256x512xbf16, #tpu.memory_space<vmem>>, vector<256x512xbf16>
    %cst_8 = arith.constant dense<0.000000e+00> : vector<8x512xf32>
    %11 = tpu.matmul %9, %10, %cst_8 {dimension_numbers = #tpu.dot_dimension_numbers<[1], [0], [0], [1], [0, 0, 1, 1], [], []>} : vector<8x256xbf16>, vector<256x512xbf16>, vector<8x512xf32> -> vector<8x512xf32>
    %c0_9 = arith.constant 0 : index
    %c0_10 = arith.constant 0 : index
    %12 = vector.load %arg4[%c0_9, %c0_10] : memref<1x512xf32, #tpu.memory_space<vmem>>, vector<1x512xf32>
    %13 = vector.broadcast %12 : vector<1x512xf32> to vector<8x512xf32>
    %14 = arith.addf %11, %13 : vector<8x512xf32>
    %cst_11 = arith.constant 0.000000e+00 : f32
    %15 = vector.broadcast %cst_11 : f32 to vector<8x512xf32>
    %16 = arith.maximumf %14, %15 : vector<8x512xf32>
    %17 = arith.truncf %16 : vector<8x512xf32> to vector<8x512xbf16>
    %c0_12 = arith.constant 0 : index
    %c0_13 = arith.constant 0 : index
    %18 = vector.load %arg5[%c0_12, %c0_13] : memref<512x128xbf16, #tpu.memory_space<vmem>>, vector<512x128xbf16>
    %cst_14 = arith.constant dense<0.000000e+00> : vector<8x128xf32>
    %19 = tpu.matmul %17, %18, %cst_14 {dimension_numbers = #tpu.dot_dimension_numbers<[1], [0], [0], [1], [0, 0, 1, 1], [], []>} : vector<8x512xbf16>, vector<512x128xbf16>, vector<8x128xf32> -> vector<8x128xf32>
    %c0_15 = arith.constant 0 : index
    %c0_16 = arith.constant 0 : index
    %20 = vector.load %arg6[%c0_15, %c0_16] : memref<1x128xf32, #tpu.memory_space<vmem>>, vector<1x128xf32>
    %21 = vector.broadcast %20 : vector<1x128xf32> to vector<8x128xf32>
    %22 = arith.addf %19, %21 : vector<8x128xf32>
    %23 = tpu.iota {dimensions = array<i32: 1>} : vector<8x128xi32>
    %c4_i32 = arith.constant 4 : i32
    %24 = vector.broadcast %c4_i32 : i32 to vector<8x128xi32>
    %25 = arith.cmpi slt, %23, %24 : vector<8x128xi32>
    %cst_17 = arith.constant -1.000000e+30 : f32
    %26 = vector.broadcast %cst_17 : f32 to vector<8x128xf32>
    %27 = arith.select %25, %22, %26 : vector<8x128xi1>, vector<8x128xf32>
    %cst_18 = arith.constant dense<0xFF800000> : vector<8xf32>
    %28 = vector.multi_reduction <maximumf>, %27, %cst_18 [1] : vector<8x128xf32> to vector<8xf32>
    %29 = vector.shape_cast %28 : vector<8xf32> to vector<8x1xf32>
    %30 = vector.broadcast %29 : vector<8x1xf32> to vector<8x128xf32>
    %31 = arith.subf %27, %30 : vector<8x128xf32>
    %32 = math.exp %31 : vector<8x128xf32>
    %cst_19 = arith.constant dense<0.000000e+00> : vector<8xf32>
    %33 = vector.multi_reduction <add>, %32, %cst_19 [1] : vector<8x128xf32> to vector<8xf32>
    %34 = vector.shape_cast %33 : vector<8xf32> to vector<8x1xf32>
    %35 = vector.broadcast %34 : vector<8x1xf32> to vector<8x128xf32>
    %36 = arith.divf %32, %35 : vector<8x128xf32>
    %c0_20 = arith.constant 0 : index
    %c0_21 = arith.constant 0 : index
    %37 = vector.load %arg7[%c0_20, %c0_21] : memref<8x128xf32, #tpu.memory_space<vmem>>, vector<8x128xf32>
    tpu.vector_store %arg7[%c0_20, %c0_21], %36 {strides = array<i32>} : memref<8x128xf32, #tpu.memory_space<vmem>>, vector<8x128xf32>,
    return
  }
}

</mosaic_0001>

<bundles_post_ra>
// kernel: tpu_custom_call.1
= control target key start
LH: loop header
LB: loop body
LE: loop exit
PB: predicated region body
PF: predicated region fallthrough
CT: control target
= control target key end

     0   :  { %12 = vsyncpa [#allocation3], 0  ;;  %s3001_s0 = inlined_call_operand.hbm [shape: f32[8,768], index: 0, kind: input, shape index: {}]   ;;  %s3002_s1 = inlined_call_operand.hbm [shape: bf16[768,256], index: 1, kind: input, shape index: {}]   ;;  %s3003_s2 = inlined_call_operand.hbm [shape: f32[1,256], index: 2, kind: input, shape index: {}]   ;;  %s3004_s3 = inlined_call_operand.hbm [shape: bf16[256,512], index: 3, kind: input, shape index: {}]   ;;  %s3005_s4 = inlined_call_operand.hbm [shape: f32[1,512], index: 4, kind: input, shape index: {}]   ;;  %s3006_s5 = inlined_call_operand.hbm [shape: bf16[512,128], index: 5, kind: input, shape index: {}]   ;;  %s3007_s6 = inlined_call_operand.vmem [shape: f32[1,128], index: 6, kind: input, shape index: {}]   ;;  %s3008_s7 = inlined_call_operand.hbm [shape: f32[8,128], index: 7, kind: output, shape index: {}]  }
   0x1   :  { %13 = vsyncpa [#allocation6], 0 }
   0x2   :  { %14 = vsyncpa [#allocation9], 0 }
   0x3   :  { %15 = vsyncpa [#allocation12], 0  ;;  %s32_s26 = sshll.u32 %s3002_s1, 4  ;;  %s33_s26 = int_to_ptr.hbm [resolvable:$true] %s32_s26 }
   0x4   :  { %16 = vsyncpa [#allocation4], 0  ;;  %s2890_s27 = smov [#allocation5]   ;;  %s56_s8 = sshll.u32 %s3004_s3, 4  ;;  %s57_s8 = int_to_ptr.hbm [resolvable:$true] %s56_s8 }
   0x5   :  { %s34_s28 = sshll.u32 %s2890_s27, 4  ;;  %s2891_s9 = smov 128   ;;  %s35_s28 = int_to_ptr.vmem [resolvable:$true] %s34_s28 }
   0x6   :  { %s2892_s10 = smov 8   ;;  %s2893_s11 = smov [#allocation8]  }
   0x7   :  { %40 = dma.hbm_to_vmem [thread:$0]  %s33_s26, 12288, %s35_s28, [#allocation6], %s2891_s9, %s2891_s9, %s2892_s10  }
   0x8   :  { %s58_s12 = sshll.u32 %s2893_s11, 4  ;;  %s2894_s13 = smov 256   ;;  %s59_s12 = int_to_ptr.vmem [resolvable:$true] %s58_s12 }
   0x9   :  { %s2895_s14 = smov 16   ;;  %s22_s16 = sshll.u32 %s3001_s0, 4  ;;  %s23_s16 = int_to_ptr.hbm [resolvable:$true] %s22_s16 }
   0xa   :  { %64 = dma.hbm_to_vmem [thread:$0]  %s57_s8, 8192, %s59_s12, [#allocation9], %s2894_s13, %s2894_s13, %s2895_s14  }
   0xb   :  { %s2896_s17 = smov [#allocation2]   ;;  %s46_s20 = sshll.u32 %s3003_s2, 4  ;;  %s47_s20 = int_to_ptr.hbm [resolvable:$true] %s46_s20 }
   0xc   :  { %s24_s18 = sshll.u32 %s2896_s17, 4  ;;  %s2897_s21 = smov [#allocation7]   ;;  %s25_s18 = int_to_ptr.vmem [resolvable:$true] %s24_s18 }
   0xd   :  { %27 = dma.hbm_to_vmem [thread:$0]  %s23_s16, 768, %s25_s18, [#allocation3]  }
   0xe   :  { %s48_s22 = sshll.u32 %s2897_s21, 4  ;;  %s70_s25 = sshll.u32 %s3005_s4, 4  ;;  %s49_s22 = int_to_ptr.vmem [resolvable:$true] %s48_s22  ;;  %s71_s25 = int_to_ptr.hbm [resolvable:$true] %s70_s25 }
   0xf   :  { %51 = dma.hbm_to_vmem [thread:$0]  %s47_s20, 32, %s49_s22, [#allocation6]  }
  0x10   :  { %s80_s27 = sshll.u32 %s3006_s5, 4  ;;  %s2898_s28 = smov [#allocation10]   ;;  %s81_s27 = int_to_ptr.hbm [resolvable:$true] %s80_s27 }
  0x11   :  { %s72_s29 = sshll.u32 %s2898_s28, 4  ;;  %s2899_s2 = smov [#allocation11]   ;;  %s73_s29 = int_to_ptr.vmem [resolvable:$true] %s72_s29 }
  0x12   :  { %75 = dma.hbm_to_vmem [thread:$0]  %s71_s25, 64, %s73_s29, [#allocation9]  }
  0x13   :  { %s82_s30 = sshll.u32 %s2899_s2, 4  ;;  %s2900_s8 = smov 64   ;;  %s83_s30 = int_to_ptr.vmem [resolvable:$true] %s82_s30 }
  0x14   :  { %s2901_s9 = smov 4  }
  0x15   :  { %88 = dma.hbm_to_vmem [thread:$0]  %s81_s27, 4096, %s83_s30, [#allocation12], %s2900_s8, %s2900_s8, %s2901_s9  }
  0x16   :  { %2880 = dma.done.wait [#allocation3], 768  }
  0x17   :  { %2881 = vsyncadd [#allocation3], 4294966528 }
  0x18   :  { %2882 = dma.done.wait [#allocation6], 12320  }
  0x19   :  { %2883 = vsyncadd [#allocation6], 4294954976 }
  0x1a   :  { %2884 = dma.done.wait [#allocation9], 8256  }
  0x1b   :  { %2885 = vsyncadd [#allocation9], 4294959040 }
  0x1c   :  { %2886 = dma.done.wait [#allocation12], 4096  }
  0x1d   :  { %2887 = vsyncadd [#allocation12], 4294963200  ;;  %v1792_v0 = vld [vmem:[#allocation5 + $0x70] sm:$0xf]  ;;  %v2517_v1 = vld [vmem:[#allocation5 + $0x74] sm:$0xf0] }
  0x1e   :  { %v1856_v2 = vld [vmem:[#allocation5 + $0xf0] sm:$0xf]  ;;  %v1793_v3 = vor.u32 %v2517_v1, %v1792_v0  ;;  %v2533_v4 = vld [vmem:[#allocation5 + $0xf4] sm:$0xf0]  ;;  %v1784_v11 = vld [vmem:[#allocation5 + $0x60] sm:$0xf] }
  0x1f   :  { %v1920_v5 = vld [vmem:[#allocation5 + $0x170] sm:$0xf]  ;;  %v2549_v6 = vld [vmem:[#allocation5 + $0x174] sm:$0xf0]  ;;  %v1857_v7 = vor.u32 %v2533_v4, %v1856_v2  ;;  %v2515_v13 = vld [vmem:[#allocation5 + $0x64] sm:$0xf0] }
  0x20   :  { %v1921_v8 = vor.u32 %v2549_v6, %v1920_v5  ;;  %v1984_v9 = vld [vmem:[#allocation5 + $0x1f0] sm:$0xf]  ;;  %v2565_v10 = vld [vmem:[#allocation5 + $0x1f4] sm:$0xf0]  ;;  %709 = vmatpush.bf16.msra.mxu0 %v1793_v3  ;;  %v1848_v14 = vld [vmem:[#allocation5 + $0xe0] sm:$0xf]  ;;  %v1785_v16 = vor.u32 %v2515_v13, %v1784_v11 }
  0x21   :  { %v1985_v12 = vor.u32 %v2565_v10, %v1984_v9  ;;  %v2531_v15 = vld [vmem:[#allocation5 + $0xe4] sm:$0xf0]  ;;  %722 = vmatpush.bf16.msra.mxu1 %v1857_v7  ;;  %v1912_v18 = vld [vmem:[#allocation5 + $0x160] sm:$0xf]  ;;  %v1776_v23 = vld [vmem:[#allocation5 + $0x50] sm:$0xf] }
  0x22   :  { %735 = vmatpush.bf16.msra.mxu2 %v1921_v8  ;;  %v1849_v17 = vor.u32 %v2531_v15, %v1848_v14  ;;  %v2547_v19 = vld [vmem:[#allocation5 + $0x164] sm:$0xf0]  ;;  %v1976_v20 = vld [vmem:[#allocation5 + $0x1e0] sm:$0xf]  ;;  %v2513_v24 = vld [vmem:[#allocation5 + $0x54] sm:$0xf0] }
  0x23   :  { %748 = vmatpush.bf16.msra.mxu3 %v1985_v12  ;;  %v1913_v21 = vor.u32 %v2547_v19, %v1912_v18  ;;  %v2563_v22 = vld [vmem:[#allocation5 + $0x1e4] sm:$0xf0]  ;;  %v1840_v26 = vld [vmem:[#allocation5 + $0xd0] sm:$0xf]  ;;  %v2529_v27 = vld [vmem:[#allocation5 + $0xd4] sm:$0xf0]  ;;  %v1777_v29 = vor.u32 %v2513_v24, %v1776_v23 }
  0x24   :  { %v1977_v25 = vor.u32 %v2563_v22, %v1976_v20  ;;  %v1904_v28 = vld [vmem:[#allocation5 + $0x150] sm:$0xf]  ;;  %710 = vmatpush.bf16.msra.mxu0 %v1785_v16  ;;  %v2545_v30 = vld [vmem:[#allocation5 + $0x154] sm:$0xf0]  ;;  %v1841_v33 = vor.u32 %v2529_v27, %v1840_v26  ;;  %v1768_v35 = vld [vmem:[#allocation5 + $0x40] sm:$0xf] }
  0x25   :  { %v1968_v31 = vld [vmem:[#allocation5 + $0x1d0] sm:$0xf]  ;;  %v2561_v32 = vld [vmem:[#allocation5 + $0x1d4] sm:$0xf0]  ;;  %723 = vmatpush.bf16.msra.mxu1 %v1849_v17  ;;  %v1905_v34 = vor.u32 %v2545_v30, %v1904_v28  ;;  %v2511_v36 = vld [vmem:[#allocation5 + $0x44] sm:$0xf0] }
  0x26   :  { %736 = vmatpush.bf16.msra.mxu2 %v1913_v21  ;;  %v1832_v37 = vld [vmem:[#allocation5 + $0xc0] sm:$0xf]  ;;  %v1969_v38 = vor.u32 %v2561_v32, %v1968_v31  ;;  %v2527_v39 = vld [vmem:[#allocation5 + $0xc4] sm:$0xf0]  ;;  %v1769_v44 = vor.u32 %v2511_v36, %v1768_v35  ;;  %v1760_v47 = vld [vmem:[#allocation5 + $0x30] sm:$0xf] }
  0x27   :  { %749 = vmatpush.bf16.msra.mxu3 %v1977_v25  ;;  %v1896_v40 = vld [vmem:[#allocation5 + $0x140] sm:$0xf]  ;;  %v2543_v41 = vld [vmem:[#allocation5 + $0x144] sm:$0xf0]  ;;  %v1833_v45 = vor.u32 %v2527_v39, %v1832_v37  ;;  %v2509_v48 = vld [vmem:[#allocation5 + $0x34] sm:$0xf0] }
  0x28   :  { %v1960_v42 = vld [vmem:[#allocation5 + $0x1c0] sm:$0xf]  ;;  %v2559_v43 = vld [vmem:[#allocation5 + $0x1c4] sm:$0xf0]  ;;  %711 = vmatpush.bf16.msra.mxu0 %v1777_v29  ;;  %v1897_v46 = vor.u32 %v2543_v41, %v1896_v40  ;;  %v1824_v49 = vld [vmem:[#allocation5 + $0xb0] sm:$0xf]  ;;  %v1761_v56 = vor.u32 %v2509_v48, %v1760_v47 }
  0x29   :  { %724 = vmatpush.bf16.msra.mxu1 %v1841_v33  ;;  %v1961_v50 = vor.u32 %v2559_v43, %v1960_v42  ;;  %v2525_v51 = vld [vmem:[#allocation5 + $0xb4] sm:$0xf0]  ;;  %v1888_v52 = vld [vmem:[#allocation5 + $0x130] sm:$0xf]  ;;  %v1752_v59 = vld [vmem:[#allocation5 + $0x20] sm:$0xf] }
  0x2a   :  { %737 = vmatpush.bf16.msra.mxu2 %v1905_v34  ;;  %v2541_v53 = vld [vmem:[#allocation5 + $0x134] sm:$0xf0]  ;;  %v1952_v54 = vld [vmem:[#allocation5 + $0x1b0] sm:$0xf]  ;;  %v1825_v57 = vor.u32 %v2525_v51, %v1824_v49  ;;  %v2507_v60 = vld [vmem:[#allocation5 + $0x24] sm:$0xf0] }
  0x2b   :  { %750 = vmatpush.bf16.msra.mxu3 %v1969_v38  ;;  %v2557_v55 = vld [vmem:[#allocation5 + $0x1b4] sm:$0xf0]  ;;  %v1889_v58 = vor.u32 %v2541_v53, %v1888_v52  ;;  %v1816_v61 = vld [vmem:[#allocation5 + $0xa0] sm:$0xf]  ;;  %v2523_v63 = vld [vmem:[#allocation5 + $0xa4] sm:$0xf0]  ;;  %v1753_v4 = vor.u32 %v2507_v60, %v1752_v59 }
  0x2c   :  { %712 = vmatpush.bf16.msra.mxu0 %v1769_v44  ;;  %v1953_v62 = vor.u32 %v2557_v55, %v1952_v54  ;;  %v1880_v0 = vld [vmem:[#allocation5 + $0x120] sm:$0xf]  ;;  %v2539_v1 = vld [vmem:[#allocation5 + $0x124] sm:$0xf0]  ;;  %v1817_v5 = vor.u32 %v2523_v63, %v1816_v61  ;;  %v1744_v7 = vld [vmem:[#allocation5 + $0x10] sm:$0xf] }
  0x2d   :  { %725 = vmatpush.bf16.msra.mxu1 %v1833_v45  ;;  %v1944_v2 = vld [vmem:[#allocation5 + $0x1a0] sm:$0xf]  ;;  %v2555_v3 = vld [vmem:[#allocation5 + $0x1a4] sm:$0xf0]  ;;  %v1881_v6 = vor.u32 %v2539_v1, %v1880_v0  ;;  %v2505_v8 = vld [vmem:[#allocation5 + $0x14] sm:$0xf0] }
  0x2e   :  { %738 = vmatpush.bf16.msra.mxu2 %v1897_v46  ;;  %v1808_v9 = vld [vmem:[#allocation5 + $0x90] sm:$0xf]  ;;  %v1945_v10 = vor.u32 %v2555_v3, %v1944_v2  ;;  %v2521_v11 = vld [vmem:[#allocation5 + $0x94] sm:$0xf0]  ;;  %v1745_v16 = vor.u32 %v2505_v8, %v1744_v7  ;;  %v1736_v17 = vld [vmem:[#allocation5] sm:$0xf] }
  0x2f   :  { %751 = vmatpush.bf16.msra.mxu3 %v1961_v50  ;;  %v1872_v12 = vld [vmem:[#allocation5 + $0x110] sm:$0xf]  ;;  %v2537_v13 = vld [vmem:[#allocation5 + $0x114] sm:$0xf0]  ;;  %v2503_v18 = vld [vmem:[#allocation5 + $0x4] sm:$0xf0]  ;;  %v1809_v19 = vor.u32 %v2521_v11, %v1808_v9 }
  0x30   :  { %713 = vmatpush.bf16.msra.mxu0 %v1761_v56  ;;  %v1936_v14 = vld [vmem:[#allocation5 + $0x190] sm:$0xf]  ;;  %v2553_v15 = vld [vmem:[#allocation5 + $0x194] sm:$0xf0]  ;;  %v1873_v20 = vor.u32 %v2537_v13, %v1872_v12  ;;  %v1800_v21 = vld [vmem:[#allocation5 + $0x80] sm:$0xf]  ;;  %v1737_v31 = vor.u32 %v2503_v18, %v1736_v17 }
  0x31   :  { %726 = vmatpush.bf16.msra.mxu1 %v1825_v57  ;;  %v2519_v22 = vld [vmem:[#allocation5 + $0x84] sm:$0xf0]  ;;  %v1864_v23 = vld [vmem:[#allocation5 + $0x100] sm:$0xf]  ;;  %v1937_v24 = vor.u32 %v2553_v15, %v1936_v14  ;;  %v2048_v28 = vld [vmem:[#allocation5 + $0x270] sm:$0xf] }
  0x32   :  { %739 = vmatpush.bf16.msra.mxu2 %v1889_v58  ;;  %v2535_v25 = vld [vmem:[#allocation5 + $0x104] sm:$0xf0]  ;;  %v1928_v26 = vld [vmem:[#allocation5 + $0x180] sm:$0xf]  ;;  %v2581_v29 = vld [vmem:[#allocation5 + $0x274] sm:$0xf0]  ;;  %v1801_v35 = vor.u32 %v2519_v22, %v1800_v21 }
  0x33   :  { %752 = vmatpush.bf16.msra.mxu3 %v1953_v62  ;;  %v2551_v27 = vld [vmem:[#allocation5 + $0x184] sm:$0xf0]  ;;  %v2112_v30 = vld [vmem:[#allocation5 + $0x2f0] sm:$0xf]  ;;  %v2597_v32 = vld [vmem:[#allocation5 + $0x2f4] sm:$0xf0]  ;;  %v1865_v36 = vor.u32 %v2535_v25, %v1864_v23  ;;  %v2049_v40 = vor.u32 %v2581_v29, %v2048_v28 }
  0x34   :  { %714 = vmatpush.bf16.msra.mxu0 %v1753_v4  ;;  %v2516_v33 = vld [vmem:[#allocation5 + $0x74] sm:$0xf]  ;;  %v1794_v34 = vld [vmem:[#allocation5 + $0x78] sm:$0xf0]  ;;  %v1929_v39 = vor.u32 %v2551_v27, %v1928_v26  ;;  %v2113_v41 = vor.u32 %v2597_v32, %v2112_v30  ;;  %v2040_v43 = vld [vmem:[#allocation5 + $0x260] sm:$0xf] }
  0x35   :  { %727 = vmatpush.bf16.msra.mxu1 %v1817_v5  ;;  %v2532_v37 = vld [vmem:[#allocation5 + $0xf4] sm:$0xf]  ;;  %v1858_v38 = vld [vmem:[#allocation5 + $0xf8] sm:$0xf0]  ;;  %v1797_v42 = vor.u32 %v2516_v33, %v1794_v34  ;;  %v2579_v44 = vld [vmem:[#allocation5 + $0x264] sm:$0xf0] }
  0x36   :  { %740 = vmatpush.bf16.msra.mxu2 %v1881_v6  ;;  %v2104_v45 = vld [vmem:[#allocation5 + $0x2e0] sm:$0xf]  ;;  %v1861_v46 = vor.u32 %v2532_v37, %v1858_v38  ;;  %v2595_v47 = vld [vmem:[#allocation5 + $0x2e4] sm:$0xf0]  ;;  %v2514_v48 = vld [vmem:[#allocation5 + $0x64] sm:$0xf]  ;;  %v2041_v53 = vor.u32 %v2579_v44, %v2040_v43 }
  0x37   :  { %753 = vmatpush.bf16.msra.mxu3 %v1945_v10  ;;  %v1786_v49 = vld [vmem:[#allocation5 + $0x68] sm:$0xf0]  ;;  %v2530_v50 = vld [vmem:[#allocation5 + $0xe4] sm:$0xf]  ;;  %v115_v52 = vld [vmem:[#allocation2] sm:$0xff]  ;;  %v2105_v57 = vor.u32 %v2595_v47, %v2104_v45  ;;  %s1721_s13 = sshll.u32 %s3008_s7, 4  ;;  %s1722_s13 = int_to_ptr.hbm [resolvable:$true] %s1721_s13 }
  0x38   :  { %715 = vmatpush.bf16.msra.mxu0 %v1745_v16  ;;  %v1850_v51 = vld [vmem:[#allocation5 + $0xe8] sm:$0xf0]  ;;  %v2032_v54 = vld [vmem:[#allocation5 + $0x250] sm:$0xf]  ;;  %v2577_v55 = vld [vmem:[#allocation5 + $0x254] sm:$0xf0]  ;;  %v2961_v56 = vpack.c.bf16 %v115_v52, %v115_v52  ;;  %v1789_v58 = vor.u32 %v2514_v48, %v1786_v49 }
  0x39   :  { %728 = vmatpush.bf16.msra.mxu1 %v1809_v19  ;;  %v2096_v59 = vld [vmem:[#allocation5 + $0x2d0] sm:$0xf]  ;;  %v2593_v60 = vld [vmem:[#allocation5 + $0x2d4] sm:$0xf0]  ;;  %v2512_v61 = vld [vmem:[#allocation5 + $0x54] sm:$0xf]  ;;  %v1853_v62 = vor.u32 %v2530_v50, %v1850_v51  ;;  %v2033_v6 = vor.u32 %v2577_v55, %v2032_v54 }
  0x3a   :  { %741 = vmatpush.bf16.msra.mxu2 %v1873_v20  ;;  %v1778_v63 = vld [vmem:[#allocation5 + $0x58] sm:$0xf0]  ;;  %v117_v1 = vld [vmem:[#allocation2 + $0x10] sm:$0xff]  ;;  %v2528_v2 = vld [vmem:[#allocation5 + $0xd4] sm:$0xf]  ;;  %v2097_v8 = vor.u32 %v2593_v60, %v2096_v59 }
  0x3b   :  { %754 = vmatpush.bf16.msra.mxu3 %v1937_v24  ;;  %v116_v0 = vld [vmem:[#allocation2 + $0x8] sm:$0xff]  ;;  %v2966_v5 = vpack.c.bf16 %v117_v1, %v117_v1  ;;  %v2024_v7 = vld [vmem:[#allocation5 + $0x240] sm:$0xf]  ;;  %v1781_v9 = vor.u32 %v2512_v61, %v1778_v63  ;;  %v2575_v10 = vld [vmem:[#allocation5 + $0x244] sm:$0xf0] }
  0x3c   :  { %716 = vmatpush.bf16.msra.mxu0 %v1737_v31  ;;  %v1842_v3 = vld [vmem:[#allocation5 + $0xd8] sm:$0xf0]  ;;  %v2964_v4 = vpack.c.bf16 %v116_v0, %v116_v0  ;;  %v2088_v11 = vld [vmem:[#allocation5 + $0x2c0] sm:$0xf]  ;;  %v118_v12 = vld [vmem:[#allocation2 + $0x18] sm:$0xff]  ;;  %v2025_v20 = vor.u32 %v2575_v10, %v2024_v7 }
  0x3d   :  { %729 = vmatpush.bf16.msra.mxu1 %v1801_v35  ;;  %v1845_v13 = vor.u32 %v2528_v2, %v1842_v3  ;;  %v2591_v14 = vld [vmem:[#allocation5 + $0x2c4] sm:$0xf0]  ;;  %v2510_v15 = vld [vmem:[#allocation5 + $0x44] sm:$0xf]  ;;  %v1770_v16 = vld [vmem:[#allocation5 + $0x48] sm:$0xf0]  ;;  %v2969_v17 = vpack.c.bf16 %v118_v12, %v118_v12 }
  0x3e   :  { %742 = vmatpush.bf16.msra.mxu2 %v1865_v36  ;;  %v2526_v18 = vld [vmem:[#allocation5 + $0xc4] sm:$0xf]  ;;  %v1834_v19 = vld [vmem:[#allocation5 + $0xc8] sm:$0xf0]  ;;  %v2089_v21 = vor.u32 %v2591_v14, %v2088_v11  ;;  %v1773_v22 = vor.u32 %v2510_v15, %v1770_v16  ;;  %v2016_v23 = vld [vmem:[#allocation5 + $0x230] sm:$0xf] }
  0x3f   :  { %755 = vmatpush.bf16.msra.mxu3 %v1929_v39  ;;  %717 = vmatmul.bf16.vlgmr.msra.gmra.mxu0 %v2961_v56  ;;  %v2573_v24 = vld [vmem:[#allocation5 + $0x234] sm:$0xf0]  ;;  %v2080_v25 = vld [vmem:[#allocation5 + $0x2b0] sm:$0xf]  ;;  %v1837_v26 = vor.u32 %v2526_v18, %v1834_v19  ;;  %v2508_v28 = vld [vmem:[#allocation5 + $0x34] sm:$0xf] }
  0x40   :  { %761 = vmatpush.bf16.msrb.mxu0 %v2049_v40  ;;  %730 = vmatmul.bf16.vlgmr.msra.gmra.mxu1 %v2964_v4  ;;  %v2589_v27 = vld [vmem:[#allocation5 + $0x2b4] sm:$0xf0]  ;;  %v1762_v29 = vld [vmem:[#allocation5 + $0x38] sm:$0xf0]  ;;  %v2524_v30 = vld [vmem:[#allocation5 + $0xb4] sm:$0xf]  ;;  %v2017_v32 = vor.u32 %v2573_v24, %v2016_v23 }
  0x41   :  { %774 = vmatpush.bf16.msrb.mxu1 %v2113_v41  ;;  %743 = vmatmul.bf16.vlgmr.msra.gmra.mxu2 %v2966_v5  ;;  %v1826_v31 = vld [vmem:[#allocation5 + $0xb8] sm:$0xf0]  ;;  %v2081_v33 = vor.u32 %v2589_v27, %v2080_v25  ;;  %v1765_v34 = vor.u32 %v2508_v28, %v1762_v29  ;;  %v2008_v35 = vld [vmem:[#allocation5 + $0x220] sm:$0xf]  ;;  %v2571_v36 = vld [vmem:[#allocation5 + $0x224] sm:$0xf0] }
  0x42   :  { %787 = vmatpush.bf16.msrb.mxu2 %v1797_v42  ;;  %756 = vmatmul.bf16.vlgmr.msra.gmra.mxu3 %v2969_v17  ;;  %v2072_v37 = vld [vmem:[#allocation5 + $0x2a0] sm:$0xf]  ;;  %v1829_v38 = vor.u32 %v2524_v30, %v1826_v31  ;;  %v2587_v39 = vld [vmem:[#allocation5 + $0x2a4] sm:$0xf0]  ;;  %v2506_v40 = vld [vmem:[#allocation5 + $0x24] sm:$0xf]  ;;  %v2009_v44 = vor.u32 %v2571_v36, %v2008_v35 }
  0x43   :  { %800 = vmatpush.bf16.msrb.mxu3 %v1861_v46  ;;  %v1754_v41 = vld [vmem:[#allocation5 + $0x28] sm:$0xf0]  ;;  %v2522_v42 = vld [vmem:[#allocation5 + $0xa4] sm:$0xf]  ;;  %v2073_v45 = vor.u32 %v2587_v39, %v2072_v37  ;;  %v2000_v47 = vld [vmem:[#allocation5 + $0x210] sm:$0xf] }
  0x44   :  { %762 = vmatpush.bf16.msrb.mxu0 %v2041_v53  ;;  %v1818_v43 = vld [vmem:[#allocation5 + $0xa8] sm:$0xf0]  ;;  %v1757_v46 = vor.u32 %v2506_v40, %v1754_v41  ;;  %v2569_v48 = vld [vmem:[#allocation5 + $0x214] sm:$0xf0]  ;;  %v2064_v49 = vld [vmem:[#allocation5 + $0x290] sm:$0xf] }
  0x45   :  { %775 = vmatpush.bf16.msrb.mxu1 %v2105_v57  ;;  %v1821_v50 = vor.u32 %v2522_v42, %v1818_v43  ;;  %v2585_v51 = vld [vmem:[#allocation5 + $0x294] sm:$0xf0]  ;;  %v2504_v52 = vld [vmem:[#allocation5 + $0x14] sm:$0xf]  ;;  %v1746_v53 = vld [vmem:[#allocation5 + $0x18] sm:$0xf0]  ;;  %v2001_v57 = vor.u32 %v2569_v48, %v2000_v47 }
  0x46   :  { %788 = vmatpush.bf16.msrb.mxu2 %v1789_v58  ;;  %v2520_v54 = vld [vmem:[#allocation5 + $0x94] sm:$0xf]  ;;  %v1810_v55 = vld [vmem:[#allocation5 + $0x98] sm:$0xf0]  ;;  %v1992_v58 = vld [vmem:[#allocation5 + $0x200] sm:$0xf]  ;;  %v2065_v60 = vor.u32 %v2585_v51, %v2064_v49  ;;  %v1749_v61 = vor.u32 %v2504_v52, %v1746_v53 }
  0x47   :  { %801 = vmatpush.bf16.msrb.mxu3 %v1853_v62  ;;  %v2567_v59 = vld [vmem:[#allocation5 + $0x204] sm:$0xf0]  ;;  %v2056_v62 = vld [vmem:[#allocation5 + $0x280] sm:$0xf]  ;;  %v2502_v0 = vld [vmem:[#allocation5 + $0x4] sm:$0xf]  ;;  %v1813_v1 = vor.u32 %v2520_v54, %v1810_v55 }
  0x48   :  { %763 = vmatpush.bf16.msrb.mxu0 %v2033_v6  ;;  %v2583_v63 = vld [vmem:[#allocation5 + $0x284] sm:$0xf0]  ;;  %v1738_v2 = vld [vmem:[#allocation5 + $0x8] sm:$0xf0]  ;;  %v2518_v3 = vld [vmem:[#allocation5 + $0x84] sm:$0xf]  ;;  %v1993_v10 = vor.u32 %v2567_v59, %v1992_v58 }
  0x49   :  { %776 = vmatpush.bf16.msrb.mxu1 %v2097_v8  ;;  %v1802_v6 = vld [vmem:[#allocation5 + $0x88] sm:$0xf0]  ;;  %v2548_v7 = vld [vmem:[#allocation5 + $0x174] sm:$0xf]  ;;  %v1922_v8 = vld [vmem:[#allocation5 + $0x178] sm:$0xf0]  ;;  %v2057_v14 = vor.u32 %v2583_v63, %v2056_v62  ;;  %v1741_v15 = vor.u32 %v2502_v0, %v1738_v2 }
  0x4a   :  { %789 = vmatpush.bf16.msrb.mxu2 %v1781_v9  ;;  %v2564_v9 = vld [vmem:[#allocation5 + $0x1f4] sm:$0xf]  ;;  %v1986_v11 = vld [vmem:[#allocation5 + $0x1f8] sm:$0xf0]  ;;  %v2546_v25 = vld [vmem:[#allocation5 + $0x164] sm:$0xf] }
  0x4b   :  { %802 = vmatpush.bf16.msrb.mxu3 %v1845_v13  ;;  %v2580_v12 = vld [vmem:[#allocation5 + $0x274] sm:$0xf]  ;;  %v2050_v13 = vld [vmem:[#allocation5 + $0x278] sm:$0xf0]  ;;  %v1989_v23 = vor.u32 %v2564_v9, %v1986_v11  ;;  %v2562_v27 = vld [vmem:[#allocation5 + $0x1e4] sm:$0xf] }
  0x4c   :  { %764 = vmatpush.bf16.msrb.mxu0 %v2025_v20  ;;  %v2596_v16 = vld [vmem:[#allocation5 + $0x2f4] sm:$0xf]  ;;  %v2114_v18 = vld [vmem:[#allocation5 + $0x2f8] sm:$0xf0]  ;;  %v1805_v20 = vor.u32 %v2518_v3, %v1802_v6  ;;  %v2053_v24 = vor.u32 %v2580_v12, %v2050_v13  ;;  %v1978_v30 = vld [vmem:[#allocation5 + $0x1e8] sm:$0xf0] }
  0x4d   :  { %777 = vmatpush.bf16.msrb.mxu1 %v2089_v21  ;;  %v119_v19 = vld [vmem:[#allocation2 + $0x20] sm:$0xff]  ;;  %v1925_v21 = vor.u32 %v2548_v7, %v1922_v8  ;;  %v2117_v28 = vor.u32 %v2596_v16, %v2114_v18  ;;  %v2578_v31 = vld [vmem:[#allocation5 + $0x264] sm:$0xf]  ;;  %v2106_v35 = vld [vmem:[#allocation5 + $0x2e8] sm:$0xf0]  ;;  %v1981_v37 = vor.u32 %v2562_v27, %v1978_v30 }
  0x4e   :  { %790 = vmatpush.bf16.msrb.mxu2 %v1773_v22  ;;  %v120_v22 = vld [vmem:[#allocation2 + $0x28] sm:$0xff]  ;;  %v2973_v29 = vpack.c.bf16 %v119_v19, %v119_v19  ;;  %v2544_v39 = vld [vmem:[#allocation5 + $0x154] sm:$0xf]  ;;  %v2542_v51 = vld [vmem:[#allocation5 + $0x144] sm:$0xf] }
  0x4f   :  { %803 = vmatpush.bf16.msrb.mxu3 %v1837_v26  ;;  %v1914_v26 = vld [vmem:[#allocation5 + $0x168] sm:$0xf0]  ;;  %v1906_v40 = vld [vmem:[#allocation5 + $0x158] sm:$0xf0]  ;;  %v2560_v41 = vld [vmem:[#allocation5 + $0x1d4] sm:$0xf] }
  0x50   :  { %765 = vmatpush.bf16.msrb.mxu0 %v2017_v32  ;;  %v2042_v32 = vld [vmem:[#allocation5 + $0x268] sm:$0xf0]  ;;  %v1917_v36 = vor.u32 %v2546_v25, %v1914_v26  ;;  %v1970_v43 = vld [vmem:[#allocation5 + $0x1d8] sm:$0xf0]  ;;  %v1909_v48 = vor.u32 %v2544_v39, %v1906_v40  ;;  %v2558_v53 = vld [vmem:[#allocation5 + $0x1c4] sm:$0xf] }
  0x51   :  { %778 = vmatpush.bf16.msrb.mxu1 %v2081_v33  ;;  %v2975_v33 = vpack.c.bf16 %v120_v22, %v120_v22  ;;  %v2098_v47 = vld [vmem:[#allocation5 + $0x2d8] sm:$0xf0]  ;;  %v1973_v49 = vor.u32 %v2560_v41, %v1970_v43  ;;  %v1898_v52 = vld [vmem:[#allocation5 + $0x148] sm:$0xf0]  ;;  %v2590_v59 = vld [vmem:[#allocation5 + $0x2c4] sm:$0xf] }
  0x52   :  { %791 = vmatpush.bf16.msrb.mxu2 %v1765_v34  ;;  %v2594_v34 = vld [vmem:[#allocation5 + $0x2e4] sm:$0xf]  ;;  %v1962_v55 = vld [vmem:[#allocation5 + $0x1c8] sm:$0xf0]  ;;  %v2540_v62 = vld [vmem:[#allocation5 + $0x134] sm:$0xf] }
  0x53   :  { %804 = vmatpush.bf16.msrb.mxu3 %v1829_v38  ;;  %v2045_v38 = vor.u32 %v2578_v31, %v2042_v32  ;;  %v2109_v42 = vor.u32 %v2594_v34, %v2106_v35  ;;  %v2026_v58 = vld [vmem:[#allocation5 + $0x248] sm:$0xf0]  ;;  %v1890_v63 = vld [vmem:[#allocation5 + $0x138] sm:$0xf0]  ;;  %v2556_v0 = vld [vmem:[#allocation5 + $0x1b4] sm:$0xf] }
  0x54   :  { %766 = vmatpush.bf16.msrb.mxu0 %v2009_v44  ;;  %v2576_v44 = vld [vmem:[#allocation5 + $0x254] sm:$0xf]  ;;  %v1954_v2 = vld [vmem:[#allocation5 + $0x1b8] sm:$0xf0]  ;;  %v1893_v9 = vor.u32 %v2540_v62, %v1890_v63  ;;  %v2538_v12 = vld [vmem:[#allocation5 + $0x124] sm:$0xf] }
  0x55   :  { %779 = vmatpush.bf16.msrb.mxu1 %v2073_v45  ;;  %v2034_v45 = vld [vmem:[#allocation5 + $0x258] sm:$0xf0]  ;;  %v2572_v3 = vld [vmem:[#allocation5 + $0x234] sm:$0xf]  ;;  %v1882_v13 = vld [vmem:[#allocation5 + $0x128] sm:$0xf0] }
  0x56   :  { %792 = vmatpush.bf16.msrb.mxu2 %v1757_v46  ;;  %v2592_v46 = vld [vmem:[#allocation5 + $0x2d4] sm:$0xf]  ;;  %v2018_v6 = vld [vmem:[#allocation5 + $0x238] sm:$0xf0]  ;;  %v1946_v16 = vld [vmem:[#allocation5 + $0x1a8] sm:$0xf0]  ;;  %v1885_v22 = vor.u32 %v2538_v12, %v1882_v13 }
  0x57   :  { %805 = vmatpush.bf16.msrb.mxu3 %v1821_v50  ;;  %v2037_v50 = vor.u32 %v2576_v44, %v2034_v45  ;;  %v2101_v54 = vor.u32 %v2592_v46, %v2098_v47  ;;  %v2588_v7 = vld [vmem:[#allocation5 + $0x2b4] sm:$0xf]  ;;  %v2082_v8 = vld [vmem:[#allocation5 + $0x2b8] sm:$0xf0]  ;;  %v2021_v11 = vor.u32 %v2572_v3, %v2018_v6  ;;  %v2570_v18 = vld [vmem:[#allocation5 + $0x224] sm:$0xf] }
  0x58   :  { %767 = vmatpush.bf16.msrb.mxu0 %v2001_v57  ;;  %v2574_v57 = vld [vmem:[#allocation5 + $0x244] sm:$0xf]  ;;  %v2010_v19 = vld [vmem:[#allocation5 + $0x228] sm:$0xf0]  ;;  %v2536_v25 = vld [vmem:[#allocation5 + $0x114] sm:$0xf] }
  0x59   :  { %780 = vmatpush.bf16.msrb.mxu1 %v2065_v60  ;;  %v1901_v60 = vor.u32 %v2542_v51, %v1898_v52  ;;  %v1874_v26 = vld [vmem:[#allocation5 + $0x118] sm:$0xf0]  ;;  %v2552_v27 = vld [vmem:[#allocation5 + $0x194] sm:$0xf]  ;;  %v1866_v40 = vld [vmem:[#allocation5 + $0x108] sm:$0xf0] }
  0x5a   :  { %793 = vmatpush.bf16.msrb.mxu2 %v1749_v61  ;;  %v1965_v61 = vor.u32 %v2558_v53, %v1962_v55  ;;  %v1938_v30 = vld [vmem:[#allocation5 + $0x198] sm:$0xf0]  ;;  %v2568_v31 = vld [vmem:[#allocation5 + $0x214] sm:$0xf]  ;;  %v2550_v41 = vld [vmem:[#allocation5 + $0x184] sm:$0xf] }
  0x5b   :  { %806 = vmatpush.bf16.msrb.mxu3 %v1813_v1  ;;  %v2002_v32 = vld [vmem:[#allocation5 + $0x218] sm:$0xf0]  ;;  %v2584_v34 = vld [vmem:[#allocation5 + $0x294] sm:$0xf]  ;;  %v2566_v44 = vld [vmem:[#allocation5 + $0x204] sm:$0xf] }
  0x5c   :  { %768 = vmatpush.bf16.msrb.mxu0 %v1993_v10  ;;  %v1957_v10 = vor.u32 %v2556_v0, %v1954_v2  ;;  %v2066_v35 = vld [vmem:[#allocation5 + $0x298] sm:$0xf0]  ;;  %v2005_v39 = vor.u32 %v2568_v31, %v2002_v32  ;;  %v1994_v45 = vld [vmem:[#allocation5 + $0x208] sm:$0xf0]  ;;  %v2582_v46 = vld [vmem:[#allocation5 + $0x284] sm:$0xf] }
  0x5d   :  { %781 = vmatpush.bf16.msrb.mxu1 %v2057_v14  ;;  %v2554_v14 = vld [vmem:[#allocation5 + $0x1a4] sm:$0xf]  ;;  %v2069_v43 = vor.u32 %v2584_v34, %v2066_v35  ;;  %v2058_v47 = vld [vmem:[#allocation5 + $0x288] sm:$0xf0]  ;;  %v2234_v52 = vld [vmem:[#allocation8 + $0xf0] sm:$0xf0] }
  0x5e   :  { %794 = vmatpush.bf16.msrb.mxu2 %v1741_v15  ;;  %v2085_v15 = vor.u32 %v2588_v7, %v2082_v8  ;;  %v2626_v51 = vld [vmem:[#allocation8 + $0xe4] sm:$0xf]  ;;  %v2061_v55 = vor.u32 %v2582_v46, %v2058_v47  ;;  %v2200_v63 = vld [vmem:[#allocation8 + $0xa0] sm:$0xf]  ;;  %v2620_v0 = vld [vmem:[#allocation8 + $0xac] sm:$0xf0] }
  0x5f   :  { %807 = vmatpush.bf16.msrb.mxu3 %v1805_v20  ;;  %769 = vmatmul.bf16.vlgmr.msrb.gmra.mxu0 %v2973_v29  ;;  %v2586_v20 = vld [vmem:[#allocation5 + $0x2a4] sm:$0xf]  ;;  %v2202_v2 = vld [vmem:[#allocation8 + $0xb0] sm:$0xf0]  ;;  %v2201_v3 = vor.u32 %v2620_v0, %v2200_v63  ;;  %v2616_v8 = vld [vmem:[#allocation8 + $0x8c] sm:$0xf0] }
  0x60   :  { %813 = vmatpush.bf16.msra.mxu0 %v1925_v21  ;;  %782 = vmatmul.bf16.vlgmr.msrb.gmra.mxu1 %v2975_v33  ;;  %v2074_v21 = vld [vmem:[#allocation5 + $0x2a8] sm:$0xf0]  ;;  %v2184_v7 = vld [vmem:[#allocation8 + $0x80] sm:$0xf]  ;;  %v2610_v13 = vld [vmem:[#allocation8 + $0x64] sm:$0xf] }
  0x61   :  { %826 = vmatpush.bf16.msra.mxu1 %v1989_v23  ;;  %795 = vmatmul.bf16.vlgmr.msrb.gmra.mxu2 %v2961_v56  ;;  %v2090_v56 = vld [vmem:[#allocation5 + $0x2c8] sm:$0xf0]  ;;  %v1949_v23 = vor.u32 %v2554_v14, %v1946_v16  ;;  %v2168_v12 = vld [vmem:[#allocation8 + $0x60] sm:$0xf]  ;;  %v2608_v16 = vld [vmem:[#allocation8 + $0x4c] sm:$0xf0] }
  0x62   :  { %839 = vmatpush.bf16.msra.mxu2 %v2053_v24  ;;  %808 = vmatmul.bf16.vlgmr.msrb.gmra.mxu3 %v2964_v4  ;;  %v2029_v4 = vor.u32 %v2574_v57, %v2026_v58  ;;  %v2093_v1 = vor.u32 %v2590_v59, %v2090_v56  ;;  %v2013_v24 = vor.u32 %v2570_v18, %v2010_v19  ;;  %v2216_v59 = vld [vmem:[#allocation8 + $0xc0] sm:$0xf]  ;;  %v2624_v56 = vld [vmem:[#allocation8 + $0xcc] sm:$0xf0]  ;;  %v2606_v18 = vld [vmem:[#allocation8 + $0x44] sm:$0xf] }
  0x63   :  { %852 = vmatpush.bf16.msra.mxu3 %v2117_v28  ;;  %v2077_v28 = vor.u32 %v2586_v20, %v2074_v21  ;;  %v2237_v58 = vor.u32 %v2626_v51, %v2234_v52  ;;  %v2154_v20 = vld [vmem:[#allocation8 + $0x50] sm:$0xf0]  ;;  %v2598_v31 = vld [vmem:[#allocation8 + $0x4] sm:$0xf]  ;;  %v2226_v46 = vld [vmem:[#allocation8 + $0xd8] sm:$0xf0] }
  0x64   :  { %814 = vmatpush.bf16.msra.mxu0 %v1917_v36  ;;  %v1877_v36 = vor.u32 %v2536_v25, %v1874_v26  ;;  %v2157_v21 = vor.u32 %v2606_v18, %v2154_v20  ;;  %v2138_v26 = vld [vmem:[#allocation8 + $0x30] sm:$0xf0] }
  0x65   :  { %827 = vmatpush.bf16.msra.mxu1 %v1981_v37  ;;  %v2534_v37 = vld [vmem:[#allocation5 + $0x104] sm:$0xf]  ;;  %v2122_v34 = vld [vmem:[#allocation8 + $0x10] sm:$0xf0] }
  0x66   :  { %840 = vmatpush.bf16.msra.mxu2 %v2045_v38  ;;  %v1941_v38 = vor.u32 %v2552_v27, %v1938_v30  ;;  %v2600_v30 = vld [vmem:[#allocation8 + $0xc] sm:$0xf0]  ;;  %v2125_v35 = vor.u32 %v2598_v31, %v2122_v34  ;;  %v2362_v52 = vld [vmem:[#allocation8 + $0x1f0] sm:$0xf0]  ;;  %v2609_v31 = vld [vmem:[#allocation8 + $0x54] sm:$0xf0] }
  0x67   :  { %853 = vmatpush.bf16.msra.mxu3 %v2109_v42  ;;  %v1930_v42 = vld [vmem:[#allocation5 + $0x188] sm:$0xf0]  ;;  %v2346_v0 = vld [vmem:[#allocation8 + $0x1d0] sm:$0xf0] }
  0x68   :  { %815 = vmatpush.bf16.msra.mxu0 %v1909_v48  ;;  %v2232_v48 = vld [vmem:[#allocation8 + $0xe0] sm:$0xf]  ;;  %v1933_v53 = vor.u32 %v2550_v41, %v1930_v42  ;;  %v2224_v42 = vld [vmem:[#allocation8 + $0xc8] sm:$0xf] }
  0x69   :  { %828 = vmatpush.bf16.msra.mxu1 %v1973_v49  ;;  %v2628_v49 = vld [vmem:[#allocation8 + $0xec] sm:$0xf0] }
  0x6a   :  { %841 = vmatpush.bf16.msra.mxu2 %v2037_v50  ;;  %v1869_v50 = vor.u32 %v2534_v37, %v1866_v40  ;;  %v2233_v57 = vor.u32 %v2628_v49, %v2232_v48  ;;  %v2629_v37 = vld [vmem:[#allocation8 + $0xf4] sm:$0xf0]  ;;  %v2242_v40 = vld [vmem:[#allocation8 + $0xf8] sm:$0xf0]  ;;  %v2360_v48 = vld [vmem:[#allocation8 + $0x1e0] sm:$0xf] }
  0x6b   :  { %854 = vmatpush.bf16.msra.mxu3 %v2101_v54  ;;  %v1997_v54 = vor.u32 %v2566_v44, %v1994_v45  ;;  %v2623_v44 = vld [vmem:[#allocation8 + $0xcc] sm:$0xf]  ;;  %v2660_v49 = vld [vmem:[#allocation8 + $0x1ec] sm:$0xf0] }
  0x6c   :  { %816 = vmatpush.bf16.msra.mxu0 %v1901_v60  ;;  %v2622_v60 = vld [vmem:[#allocation8 + $0xc4] sm:$0xf]  ;;  %v2229_v47 = vor.u32 %v2623_v44, %v2226_v46  ;;  %v2361_v51 = vor.u32 %v2660_v49, %v2360_v48  ;;  %v2298_v44 = vld [vmem:[#allocation8 + $0x170] sm:$0xf0]  ;;  %v2603_v48 = vld [vmem:[#allocation8 + $0x2c] sm:$0xf] }
  0x6d   :  { %829 = vmatpush.bf16.msra.mxu1 %v1965_v61  ;;  %v2218_v61 = vld [vmem:[#allocation8 + $0xd0] sm:$0xf0]  ;;  %v2146_v49 = vld [vmem:[#allocation8 + $0x38] sm:$0xf0] }
  0x6e   :  { %842 = vmatpush.bf16.msra.mxu2 %v2029_v4  ;;  %v2217_v4 = vor.u32 %v2624_v56, %v2216_v59  ;;  %v2221_v62 = vor.u32 %v2622_v60, %v2218_v61  ;;  %v2210_v56 = vld [vmem:[#allocation8 + $0xb8] sm:$0xf0]  ;;  %v2344_v61 = vld [vmem:[#allocation8 + $0x1c0] sm:$0xf] }
  0x6f   :  { %855 = vmatpush.bf16.msra.mxu3 %v2093_v1  ;;  %v2618_v1 = vld [vmem:[#allocation8 + $0xa4] sm:$0xf] }
  0x70   :  { %817 = vmatpush.bf16.msra.mxu0 %v1893_v9  ;;  %v2205_v6 = vor.u32 %v2618_v1, %v2202_v2  ;;  %v2614_v9 = vld [vmem:[#allocation8 + $0x84] sm:$0xf]  ;;  %v2192_v2 = vld [vmem:[#allocation8 + $0x88] sm:$0xf] }
  0x71   :  { %830 = vmatpush.bf16.msra.mxu1 %v1957_v10  ;;  %v2185_v10 = vor.u32 %v2616_v8, %v2184_v7  ;;  %v2987_v7 = vld [vmem:[#allocation7] sm:$0x3] }
  0x72   :  { %843 = vmatpush.bf16.msra.mxu2 %v2021_v11  ;;  %v225_v18 = vperm.slane %v2987_v7, 0 }
  0x73   :  { %856 = vmatpush.bf16.msra.mxu3 %v2085_v15  ;;  %v2152_v15 = vld [vmem:[#allocation8 + $0x40] sm:$0xf] }
  0x74   :  { %818 = vmatpush.bf16.msra.mxu0 %v1885_v22  ;;  %v2153_v19 = vor.u32 %v2608_v16, %v2152_v15  ;;  %v2136_v22 = vld [vmem:[#allocation8 + $0x20] sm:$0xf]  ;;  %v2613_v15 = vld [vmem:[#allocation8 + $0x74] sm:$0xf0]  ;;  %v2611_v16 = vld [vmem:[#allocation8 + $0x6c] sm:$0xf] }
  0x75   :  { %831 = vmatpush.bf16.msra.mxu1 %v1949_v23  ;;  %v2604_v23 = vld [vmem:[#allocation8 + $0x2c] sm:$0xf0] }
  0x76   :  { %844 = vmatpush.bf16.msra.mxu2 %v2013_v24  ;;  %v2602_v24 = vld [vmem:[#allocation8 + $0x24] sm:$0xf]  ;;  %v2137_v25 = vor.u32 %v2604_v23, %v2136_v22  ;;  %v2312_v22 = vld [vmem:[#allocation8 + $0x180] sm:$0xf] }
  0x77   :  { %857 = vmatpush.bf16.msra.mxu3 %v2077_v28  ;;  %v2141_v27 = vor.u32 %v2602_v24, %v2138_v26  ;;  %v2120_v28 = vld [vmem:[#allocation8] sm:$0xf]  ;;  %v2648_v24 = vld [vmem:[#allocation8 + $0x18c] sm:$0xf0]  ;;  %v2314_v26 = vld [vmem:[#allocation8 + $0x190] sm:$0xf0] }
  0x78   :  { %819 = vmatpush.bf16.msra.mxu0 %v1877_v36  ;;  %v2121_v32 = vor.u32 %v2600_v30, %v2120_v28  ;;  %v2240_v36 = vld [vmem:[#allocation8 + $0xe8] sm:$0xf] }
  0x79   :  { %832 = vmatpush.bf16.msra.mxu1 %v1941_v38  ;;  %v2627_v38 = vld [vmem:[#allocation8 + $0xec] sm:$0xf]  ;;  %v2160_v30 = vld [vmem:[#allocation8 + $0x48] sm:$0xf] }
  0x7a   :  { %845 = vmatpush.bf16.msra.mxu2 %v2005_v39  ;;  %v2241_v39 = vor.u32 %v2629_v37, %v2240_v36  ;;  %v2245_v41 = vor.u32 %v2627_v38, %v2242_v40  ;;  %v2162_v36 = vld [vmem:[#allocation8 + $0x58] sm:$0xf0]  ;;  %v2296_v37 = vld [vmem:[#allocation8 + $0x160] sm:$0xf]  ;;  %v2644_v38 = vld [vmem:[#allocation8 + $0x16c] sm:$0xf0] }
  0x7b   :  { %858 = vmatpush.bf16.msra.mxu3 %v2069_v43  ;;  %v2625_v43 = vld [vmem:[#allocation8 + $0xd4] sm:$0xf0] }
  0x7c   :  { %820 = vmatpush.bf16.msra.mxu0 %v1869_v50  ;;  %v2225_v45 = vor.u32 %v2625_v43, %v2224_v42  ;;  %v2658_v50 = vld [vmem:[#allocation8 + $0x1e4] sm:$0xf]  ;;  %v2297_v42 = vor.u32 %v2644_v38, %v2296_v37  ;;  %v2651_v37 = vld [vmem:[#allocation8 + $0x1ac] sm:$0xf] }
  0x7d   :  { %833 = vmatpush.bf16.msra.mxu1 %v1933_v53  ;;  %v2365_v53 = vor.u32 %v2658_v50, %v2362_v52  ;;  %v2642_v43 = vld [vmem:[#allocation8 + $0x164] sm:$0xf]  ;;  %v2640_v52 = vld [vmem:[#allocation8 + $0x14c] sm:$0xf0] }
  0x7e   :  { %846 = vmatpush.bf16.msra.mxu2 %v1997_v54  ;;  %v2208_v54 = vld [vmem:[#allocation8 + $0xa8] sm:$0xf]  ;;  %v2301_v46 = vor.u32 %v2642_v43, %v2298_v44 }
  0x7f   :  { %859 = vmatpush.bf16.msra.mxu3 %v2061_v55  ;;  %821 = vmatmul.bf16.vlgmr.msra.gmra.mxu0 %v2966_v5  ;;  %v2186_v5 = vld [vmem:[#allocation8 + $0x90] sm:$0xf0]  ;;  %v2621_v55 = vld [vmem:[#allocation8 + $0xb4] sm:$0xf0] }
  0x80   :  { %1263 = vmatpush.bf16.msrb.mxu0 %v2233_v57  ;;  %834 = vmatmul.bf16.vlgmr.msra.gmra.mxu1 %v2969_v17  ;;  %v2189_v11 = vor.u32 %v2614_v9, %v2186_v5  ;;  %v2612_v17 = vld [vmem:[#allocation8 + $0x6c] sm:$0xf0]  ;;  %v2619_v57 = vld [vmem:[#allocation8 + $0xac] sm:$0xf]  ;;  %v2209_v59 = vor.u32 %v2621_v55, %v2208_v54  ;;  %v2194_v5 = vld [vmem:[#allocation8 + $0x98] sm:$0xf0]  ;;  %v2149_v55 = vor.u32 %v2603_v48, %v2146_v49 }
  0x81   :  { %847 = vmatmul.bf16.vlgmr.msra.gmra.mxu2 %v2973_v29  ;;  %v2170_v29 = vld [vmem:[#allocation8 + $0x70] sm:$0xf0]  ;;  %v2169_v14 = vor.u32 %v2612_v17, %v2168_v12  ;;  %1276 = vmatpush.bf16.msrb.mxu1 %v2361_v51  ;;  %v2213_v60 = vor.u32 %v2619_v57, %v2210_v56  ;;  %v2652_v12 = vld [vmem:[#allocation8 + $0x1ac] sm:$0xf0]  ;;  %v2650_v17 = vld [vmem:[#allocation8 + $0x1a4] sm:$0xf] }
  0x82   :  { %1289 = vmatpush.bf16.msrb.mxu2 %v2237_v58  ;;  %860 = vmatmul.bf16.vlgmr.msra.gmra.mxu3 %v2975_v33  ;;  %v2173_v33 = vor.u32 %v2610_v13, %v2170_v29  ;;  %v2330_v29 = vld [vmem:[#allocation8 + $0x1b0] sm:$0xf0]  ;;  %v2280_v51 = vld [vmem:[#allocation8 + $0x140] sm:$0xf]  ;;  %v2601_v56 = vld [vmem:[#allocation8 + $0x14] sm:$0xf0] }
  0x83   :  { %1302 = vmatpush.bf16.msrb.mxu3 %v2365_v53  ;;  %v2638_v53 = vld [vmem:[#allocation8 + $0x144] sm:$0xf]  ;;  %v2282_v57 = vld [vmem:[#allocation8 + $0x150] sm:$0xf0]  ;;  %v2647_v48 = vld [vmem:[#allocation8 + $0x18c] sm:$0xf] }
  0x84   :  { %1264 = vmatpush.bf16.msrb.mxu0 %v2217_v4  ;;  %v2656_v4 = vld [vmem:[#allocation8 + $0x1cc] sm:$0xf0] }
  0x85   :  { %v2345_v63 = vor.u32 %v2656_v4, %v2344_v61  ;;  %v2599_v61 = vld [vmem:[#allocation8 + $0xc] sm:$0xf]  ;;  %v2130_v4 = vld [vmem:[#allocation8 + $0x18] sm:$0xf0] }
  0x86   :  { %1290 = vmatpush.bf16.msrb.mxu2 %v2221_v62  ;;  %v2654_v62 = vld [vmem:[#allocation8 + $0x1c4] sm:$0xf] }
  0x87   :  { %v2349_v1 = vor.u32 %v2654_v62, %v2346_v0  ;;  %1277 = vmatpush.bf16.msrb.mxu1 %v2345_v63  ;;  %v2285_v62 = vor.u32 %v2638_v53, %v2282_v57  ;;  %v2264_v63 = vld [vmem:[#allocation8 + $0x120] sm:$0xf]  ;;  %v2636_v0 = vld [vmem:[#allocation8 + $0x12c] sm:$0xf0]  ;;  %v2304_v53 = vld [vmem:[#allocation8 + $0x168] sm:$0xf] }
  0x88   :  { %1265 = vmatpush.bf16.msrb.mxu0 %v2201_v3  ;;  %v2617_v3 = vld [vmem:[#allocation8 + $0x94] sm:$0xf0] }
  0x89   :  { %v2193_v9 = vor.u32 %v2617_v3, %v2192_v2  ;;  %1303 = vmatpush.bf16.msrb.mxu3 %v2349_v1  ;;  %v2634_v2 = vld [vmem:[#allocation8 + $0x124] sm:$0xf]  ;;  %v2266_v3 = vld [vmem:[#allocation8 + $0x130] sm:$0xf0] }
  0x8a   :  { %1291 = vmatpush.bf16.msrb.mxu2 %v2205_v6  ;;  %v2615_v6 = vld [vmem:[#allocation8 + $0x8c] sm:$0xf] }
  0x8c   :  { %1266 = vmatpush.bf16.msrb.mxu0 %v2185_v10  ;;  %v2197_v10 = vor.u32 %v2615_v6, %v2194_v5 }
  0x8e   :  { %1292 = vmatpush.bf16.msrb.mxu2 %v2189_v11  ;;  %v2328_v11 = vld [vmem:[#allocation8 + $0x1a0] sm:$0xf] }
  0x8f   :  { %v2329_v13 = vor.u32 %v2652_v12, %v2328_v11  ;;  %v2269_v11 = vor.u32 %v2634_v2, %v2266_v3  ;;  %v2272_v3 = vld [vmem:[#allocation8 + $0x128] sm:$0xf] }
  0x90   :  { %1267 = vmatpush.bf16.msrb.mxu0 %v2169_v14  ;;  %v2333_v14 = vor.u32 %v2650_v17, %v2330_v29  ;;  %v2248_v17 = vld [vmem:[#allocation8 + $0x100] sm:$0xf]  ;;  %v2630_v29 = vld [vmem:[#allocation8 + $0x104] sm:$0xf] }
  0x91   :  { %1278 = vmatpush.bf16.msrb.mxu1 %v2329_v13  ;;  %v2632_v13 = vld [vmem:[#allocation8 + $0x10c] sm:$0xf0] }
  0x92   :  { %1293 = vmatpush.bf16.msrb.mxu2 %v2173_v33  ;;  %v2176_v33 = vld [vmem:[#allocation8 + $0x68] sm:$0xf]  ;;  %1304 = vmatpush.bf16.msrb.mxu3 %v2333_v14  ;;  %v2249_v14 = vor.u32 %v2632_v13, %v2248_v17  ;;  %v226_v17 = vperm.slane %v2987_v7, 1  ;;  %v2631_v13 = vld [vmem:[#allocation8 + $0x10c] sm:$0xf] }
  0x93   :  { %v2177_v20 = vor.u32 %v2613_v15, %v2176_v33  ;;  %v2250_v33 = vld [vmem:[#allocation8 + $0x110] sm:$0xf0] }
  0x94   :  { %1268 = vmatpush.bf16.msrb.mxu0 %v2153_v19  ;;  %v2253_v15 = vor.u32 %v2630_v29, %v2250_v33  ;;  %v2258_v29 = vld [vmem:[#allocation8 + $0x118] sm:$0xf0] }
  0x95   :  { %v2261_v33 = vor.u32 %v2631_v13, %v2258_v29 }
  0x96   :  { %1294 = vmatpush.bf16.msrb.mxu2 %v2157_v21  ;;  %v2178_v21 = vld [vmem:[#allocation8 + $0x78] sm:$0xf0] }
  0x97   :  { %v2181_v23 = vor.u32 %v2611_v16, %v2178_v21  ;;  %v2661_v16 = vld [vmem:[#allocation8 + $0x1f4] sm:$0xf0]  ;;  %v2370_v21 = vld [vmem:[#allocation8 + $0x1f8] sm:$0xf0] }
  0x98   :  { %1269 = vmatpush.bf16.msrb.mxu0 %v2137_v25  ;;  %v2646_v25 = vld [vmem:[#allocation8 + $0x184] sm:$0xf] }
  0x99   :  { %v2317_v28 = vor.u32 %v2646_v25, %v2314_v26  ;;  %v2657_v25 = vld [vmem:[#allocation8 + $0x1d4] sm:$0xf0]  ;;  %v2655_v26 = vld [vmem:[#allocation8 + $0x1cc] sm:$0xf] }
  0x9a   :  { %1295 = vmatpush.bf16.msrb.mxu2 %v2141_v27  ;;  %v2313_v27 = vor.u32 %v2648_v24, %v2312_v22  ;;  %v2352_v24 = vld [vmem:[#allocation8 + $0x1c8] sm:$0xf] }
  0x9b   :  { %1305 = vmatpush.bf16.msrb.mxu3 %v2317_v28 }
  0x9c   :  { %1270 = vmatpush.bf16.msrb.mxu0 %v2121_v32  ;;  %v2607_v32 = vld [vmem:[#allocation8 + $0x4c] sm:$0xf]  ;;  %1279 = vmatpush.bf16.msrb.mxu1 %v2313_v27 }
  0x9e   :  { %1296 = vmatpush.bf16.msrb.mxu2 %v2125_v35  ;;  %v2161_v35 = vor.u32 %v2609_v31, %v2160_v30  ;;  %v2353_v30 = vor.u32 %v2657_v25, %v2352_v24  ;;  %v2354_v31 = vld [vmem:[#allocation8 + $0x1d8] sm:$0xf0] }
  0x9f   :  { %1306 = vmatpush.bf16.msrb.mxu3 %v2301_v46  ;;  %v2320_v46 = vld [vmem:[#allocation8 + $0x188] sm:$0xf] }
  0xa0   :  { %1315 = vmatpush.bf16.msra.mxu0 %v2241_v39  ;;  %1280 = vmatpush.bf16.msrb.mxu1 %v2297_v42 }
  0xa2   :  { %1341 = vmatpush.bf16.msra.mxu2 %v2245_v41  ;;  %v2165_v41 = vor.u32 %v2607_v32, %v2162_v36  ;;  %v2357_v32 = vor.u32 %v2655_v26, %v2354_v31  ;;  %v2653_v36 = vld [vmem:[#allocation8 + $0x1b4] sm:$0xf0]  ;;  %v2669_v31 = vld [vmem:[#allocation11 + $0x38] sm:$0xff] }
  0xa3   :  { %1307 = vmatpush.bf16.msrb.mxu3 %v2285_v62  ;;  %v2290_v62 = vld [vmem:[#allocation8 + $0x158] sm:$0xf0] }
  0xa4   :  { %1316 = vmatpush.bf16.msra.mxu0 %v2225_v45  ;;  %v2144_v45 = vld [vmem:[#allocation8 + $0x28] sm:$0xf] }
  0xa6   :  { %1342 = vmatpush.bf16.msra.mxu2 %v2229_v47  ;;  %v2605_v47 = vld [vmem:[#allocation8 + $0x34] sm:$0xf0] }
  0xa7   :  { %v2145_v50 = vor.u32 %v2605_v47, %v2144_v45  ;;  %1308 = vmatpush.bf16.msrb.mxu3 %v2269_v11  ;;  %v2649_v47 = vld [vmem:[#allocation8 + $0x194] sm:$0xf0]  ;;  %v2256_v11 = vld [vmem:[#allocation8 + $0x108] sm:$0xf] }
  0xa8   :  { %1317 = vmatpush.bf16.msra.mxu0 %v2209_v59  ;;  %v2128_v59 = vld [vmem:[#allocation8 + $0x8] sm:$0xf] }
  0xa9   :  { %v2129_v1 = vor.u32 %v2601_v56, %v2128_v59  ;;  %v2306_v59 = vld [vmem:[#allocation8 + $0x178] sm:$0xf0]  ;;  %v2288_v56 = vld [vmem:[#allocation8 + $0x148] sm:$0xf] }
  0xaa   :  { %1343 = vmatpush.bf16.msra.mxu2 %v2213_v60  ;;  %v2281_v60 = vor.u32 %v2640_v52, %v2280_v51  ;;  %v2322_v51 = vld [vmem:[#allocation8 + $0x198] sm:$0xf0] }
  0xab   :  { %1309 = vmatpush.bf16.msrb.mxu3 %v2253_v15  ;;  %v2325_v52 = vor.u32 %v2647_v48, %v2322_v51  ;;  %v2683_v48 = vld [vmem:[#allocation11 + $0xa8] sm:$0xff] }
  0xac   :  { %1318 = vmatpush.bf16.msra.mxu0 %v2193_v9  ;;  %v2133_v9 = vor.u32 %v2599_v61, %v2130_v4  ;;  %1281 = vmatpush.bf16.msrb.mxu1 %v2281_v60  ;;  %v2641_v60 = vld [vmem:[#allocation8 + $0x154] sm:$0xf0]  ;;  %v2639_v4 = vld [vmem:[#allocation8 + $0x14c] sm:$0xf] }
  0xad   :  { %v2293_v2 = vor.u32 %v2639_v4, %v2290_v62  ;;  %v2680_v4 = vld [vmem:[#allocation11 + $0x90] sm:$0xff] }
  0xae   :  { %1344 = vmatpush.bf16.msra.mxu2 %v2197_v10  ;;  %v2265_v10 = vor.u32 %v2636_v0, %v2264_v63  ;;  %v2289_v0 = vor.u32 %v2641_v60, %v2288_v56  ;;  %v2670_v56 = vld [vmem:[#allocation11 + $0x40] sm:$0xff] }
  0xaf   :  { %v2690_v60 = vld [vmem:[#allocation11 + $0xe0] sm:$0xff] }
  0xb0   :  { %1319 = vmatpush.bf16.msra.mxu0 %v2177_v20  ;;  %1282 = vmatpush.bf16.msrb.mxu1 %v2265_v10 }
  0xb2   :  { %1345 = vmatpush.bf16.msra.mxu2 %v2181_v23 }
  0xb4   :  { %1320 = vmatpush.bf16.msra.mxu0 %v2161_v35  ;;  %1283 = vmatpush.bf16.msrb.mxu1 %v2249_v14  ;;  %v2336_v35 = vld [vmem:[#allocation8 + $0x1a8] sm:$0xf] }
  0xb6   :  { %1346 = vmatpush.bf16.msra.mxu2 %v2165_v41 }
  0xb8   :  { %1321 = vmatpush.bf16.msra.mxu0 %v2145_v50  ;;  %v2321_v50 = vor.u32 %v2649_v47, %v2320_v46  ;;  %v2663_v47 = vld [vmem:[#allocation11 + $0x8] sm:$0xff] }
  0xba   :  { %1347 = vmatpush.bf16.msra.mxu2 %v2149_v55  ;;  %v2643_v55 = vld [vmem:[#allocation8 + $0x16c] sm:$0xf] }
  0xbb   :  { %v2309_v61 = vor.u32 %v2643_v55, %v2306_v59  ;;  %v2671_v55 = vld [vmem:[#allocation11 + $0x48] sm:$0xff]  ;;  %v2681_v59 = vld [vmem:[#allocation11 + $0x98] sm:$0xff] }
  0xbc   :  { %v2985_v58 = vpop.f32.mrf.mxu0  ;;  %1322 = vmatpush.bf16.msra.mxu0 %v2129_v1 }
  0xbd   :  { %v2989_v8 = vpop.f32.mrf.mxu1  ;;  %v719_v54 = vadd.f32 %v2985_v58, %v225_v18  ;;  %v2659_v18 = vld [vmem:[#allocation8 + $0x1ec] sm:$0xf] }
  0xbe   :  { %1348 = vmatpush.bf16.msra.mxu2 %v2133_v9  ;;  %v2373_v22 = vor.u32 %v2659_v18, %v2370_v21  ;;  %v2274_v9 = vld [vmem:[#allocation8 + $0x138] sm:$0xf0] }
  0xbf   :  { %v732_v6 = vadd.f32 %v2989_v8, %v719_v54  ;;  %v2368_v8 = vld [vmem:[#allocation8 + $0x1e8] sm:$0xf]  ;;  %v2645_v54 = vld [vmem:[#allocation8 + $0x174] sm:$0xf0] }
  0xc0   :  { %v2369_v20 = vor.u32 %v2661_v16, %v2368_v8  ;;  %1354 = vmatpush.bf16.msra.mxu3 %v2373_v22  ;;  %v2305_v57 = vor.u32 %v2645_v54, %v2304_v53  ;;  %v2682_v53 = vld [vmem:[#allocation11 + $0xa0] sm:$0xff] }
  0xc2   :  { %1328 = vmatpush.bf16.msra.mxu1 %v2369_v20 }
  0xc4   :  { %v720_v19 = vpop.f32.mrf.mxu0  ;;  %v744_v34 = vpop.f32.mrf.mxu2  ;;  %1355 = vmatpush.bf16.msra.mxu3 %v2357_v32  ;;  %v2668_v32 = vld [vmem:[#allocation11 + $0x30] sm:$0xff] }
  0xc5   :  { %v733_v39 = vpop.f32.mrf.mxu1  ;;  %v757_v40 = vpop.f32.mrf.mxu3  ;;  %v745_v12 = vadd.f32 %v744_v34, %v732_v6  ;;  %v2637_v6 = vld [vmem:[#allocation8 + $0x134] sm:$0xf0] }
  0xc6   :  { %1329 = vmatpush.bf16.msra.mxu1 %v2353_v30  ;;  %v2337_v39 = vor.u32 %v2653_v36, %v2336_v35  ;;  %v2667_v35 = vld [vmem:[#allocation11 + $0x28] sm:$0xff]  ;;  %v2676_v36 = vld [vmem:[#allocation11 + $0x70] sm:$0xff] }
  0xc7   :  { %v758_v19 = vadd.f32 %v757_v40, %v745_v12  ;;  %v2338_v40 = vld [vmem:[#allocation8 + $0x1b8] sm:$0xf0]  ;;  %v2633_v12 = vld [vmem:[#allocation8 + $0x114] sm:$0xf0] }
  0xc8   :  { %v2341_v41 = vor.u32 %v2651_v37, %v2338_v40  ;;  %v2257_v14 = vor.u32 %v2633_v12, %v2256_v11  ;;  %v2666_v37 = vld [vmem:[#allocation11 + $0x20] sm:$0xff]  ;;  %v2665_v40 = vld [vmem:[#allocation11 + $0x18] sm:$0xff] }
  0xca   :  { %1330 = vmatpush.bf16.msra.mxu1 %v2337_v39  ;;  %1356 = vmatpush.bf16.msra.mxu3 %v2341_v41  ;;  %v2685_v39 = vld [vmem:[#allocation11 + $0xb8] sm:$0xff]  ;;  %v2674_v41 = vld [vmem:[#allocation11 + $0x60] sm:$0xff] }
  0xcc   :  { %v746_v58 = vpop.f32.mrf.mxu2 }
  0xcd   :  { %v759_v5 = vpop.f32.mrf.mxu3  ;;  %v2635_v58 = vld [vmem:[#allocation8 + $0x12c] sm:$0xf] }
  0xce   :  { %1331 = vmatpush.bf16.msra.mxu1 %v2321_v50  ;;  %1357 = vmatpush.bf16.msra.mxu3 %v2325_v52  ;;  %v2273_v5 = vor.u32 %v2637_v6, %v2272_v3  ;;  %v2277_v10 = vor.u32 %v2635_v58, %v2274_v9  ;;  %v2692_v50 = vld [vmem:[#allocation11 + $0xf0] sm:$0xff]  ;;  %v2662_v52 = vld [vmem:[#allocation11] sm:$0xff]  ;;  %v2687_v58 = vld [vmem:[#allocation11 + $0xc8] sm:$0xff] }
  0xcf   :  { %v2678_v3 = vld [vmem:[#allocation11 + $0x80] sm:$0xff]  ;;  %v933_v9 = vld [vmem:[#allocation10] sm:$0xf] }
  0xd0   :  { %v935_v11 = vperm.slane %v933_v9, 0  ;;  %v936_v13 = vperm.slane %v933_v9, 1 }
  0xd2   :  { %1332 = vmatpush.bf16.msra.mxu1 %v2305_v57  ;;  %1358 = vmatpush.bf16.msra.mxu3 %v2309_v61  ;;  %v2691_v57 = vld [vmem:[#allocation11 + $0xe8] sm:$0xff] }
  0xd6   :  { %1333 = vmatpush.bf16.msra.mxu1 %v2289_v0  ;;  %1359 = vmatpush.bf16.msra.mxu3 %v2293_v2  ;;  %v2679_v0 = vld [vmem:[#allocation11 + $0x88] sm:$0xff] }
  0xda   :  { %1334 = vmatpush.bf16.msra.mxu1 %v2273_v5  ;;  %1360 = vmatpush.bf16.msra.mxu3 %v2277_v10  ;;  %v2686_v5 = vld [vmem:[#allocation11 + $0xc0] sm:$0xff] }
  0xdc   :  { %v770_v23 = vpop.f32.mrf.mxu0 }
  0xdd   :  { %v771_v27 = vadd.f32 %v770_v23, %v758_v19  ;;  %v783_v28 = vpop.f32.mrf.mxu1 }
  0xde   :  { %1335 = vmatpush.bf16.msra.mxu1 %v2257_v14  ;;  %1361 = vmatpush.bf16.msra.mxu3 %v2261_v33 }
  0xdf   :  { %v784_v34 = vadd.f32 %v783_v28, %v771_v27 }
  0xe1   :  { %v865_v38 = vmax.f32 %v784_v34, 0.0  ;;  %v2677_v34 = vld [vmem:[#allocation11 + $0x78] sm:$0xff] }
  0xe3   :  { %v867_v42 = vpack.c.bf16 %v865_v38, %v865_v38  ;;  %v2675_v38 = vld [vmem:[#allocation11 + $0x68] sm:$0xff] }
  0xe4   :  { %v796_v43 = vpop.f32.mrf.mxu2  ;;  %v772_v45 = vpop.f32.mrf.mxu0 }
  0xe5   :  { %v809_v44 = vpop.f32.mrf.mxu3  ;;  %1271 = vmatmul.bf16.vlgmr.msrb.gmra.mxu0 %v867_v42  ;;  %1297 = vmatmul.bf16.vlgmr.msrb.gmra.mxu2 %v867_v42  ;;  %v785_v49 = vpop.f32.mrf.mxu1  ;;  %v797_v15 = vadd.f32 %v796_v43, %v226_v17  ;;  %v2684_v43 = vld [vmem:[#allocation11 + $0xb0] sm:$0xff]  ;;  %v2693_v45 = vld [vmem:[#allocation11 + $0xf8] sm:$0xff] }
  0xe6   :  { %1635 = vmatpush.bf16.msrb.mxu0 %v2669_v31  ;;  %1661 = vmatpush.bf16.msrb.mxu2 %v2685_v39  ;;  %v2672_v49 = vld [vmem:[#allocation11 + $0x50] sm:$0xff] }
  0xe7   :  { %v810_v8 = vadd.f32 %v809_v44, %v797_v15  ;;  %v2673_v44 = vld [vmem:[#allocation11 + $0x58] sm:$0xff] }
  0xea   :  { %1636 = vmatpush.bf16.msrb.mxu0 %v2668_v32  ;;  %1662 = vmatpush.bf16.msrb.mxu2 %v2684_v43 }
  0xec   :  { %v798_v63 = vpop.f32.mrf.mxu2 }
  0xed   :  { %v811_v1 = vpop.f32.mrf.mxu3  ;;  %v2689_v63 = vld [vmem:[#allocation11 + $0xd8] sm:$0xff] }
  0xee   :  { %1637 = vmatpush.bf16.msrb.mxu0 %v2667_v35  ;;  %1663 = vmatpush.bf16.msrb.mxu2 %v2683_v48  ;;  %v2688_v1 = vld [vmem:[#allocation11 + $0xd0] sm:$0xff] }
  0xf2   :  { %1638 = vmatpush.bf16.msrb.mxu0 %v2666_v37  ;;  %1664 = vmatpush.bf16.msrb.mxu2 %v2682_v53 }
  0xf5   :  { %1323 = vmatmul.bf16.vlgmr.msra.gmra.mxu0 %v867_v42  ;;  %1349 = vmatmul.bf16.vlgmr.msra.gmra.mxu2 %v867_v42  ;;  %v2664_v42 = vld [vmem:[#allocation11 + $0x10] sm:$0xff] }
  0xf6   :  { %1639 = vmatpush.bf16.msrb.mxu0 %v2665_v40  ;;  %1665 = vmatpush.bf16.msrb.mxu2 %v2681_v59 }
  0xfa   :  { %1640 = vmatpush.bf16.msrb.mxu0 %v2664_v42  ;;  %1666 = vmatpush.bf16.msrb.mxu2 %v2680_v4  ;;  %v1687_v42 = vlaneseq }
  0xfc   :  { %v822_v16 = vpop.f32.mrf.mxu0 }
  0xfd   :  { %v835_v18 = vpop.f32.mrf.mxu1  ;;  %v823_v19 = vadd.f32 %v822_v16, %v810_v8 }
  0xfe   :  { %1641 = vmatpush.bf16.msrb.mxu0 %v2663_v47  ;;  %1667 = vmatpush.bf16.msrb.mxu2 %v2679_v0 }
  0xff   :  { %v836_v20 = vadd.f32 %v835_v18, %v823_v19 }
 0x102   :  { %1642 = vmatpush.bf16.msrb.mxu0 %v2662_v52  ;;  %1668 = vmatpush.bf16.msrb.mxu2 %v2678_v3 }
 0x104   :  { %v848_v21 = vpop.f32.mrf.mxu2  ;;  %v824_v7 = vpop.f32.mrf.mxu0 }
 0x105   :  { %v849_v22 = vadd.f32 %v848_v21, %v836_v20  ;;  %v861_v23 = vpop.f32.mrf.mxu3  ;;  %v837_v24 = vpop.f32.mrf.mxu1  ;;  %v937_v20 = vperm.slane %v933_v9, 2 }
 0x106   :  { %v938_v24 = vperm.slane %v933_v9, 3 }
 0x107   :  { %v862_v25 = vadd.f32 %v861_v23, %v849_v22 }
 0x109   :  { %v866_v26 = vmax.f32 %v862_v25, 0.0 }
 0x10b   :  { %v868_v27 = vpack.c.bf16 %v866_v26, %v866_v26 }
 0x10c   :  { %v850_v28 = vpop.f32.mrf.mxu2 }
 0x10d   :  { %v863_v30 = vpop.f32.mrf.mxu3  ;;  %1284 = vmatmul.bf16.vlgmr.msrb.gmra.mxu1 %v868_v27  ;;  %1310 = vmatmul.bf16.vlgmr.msrb.gmra.mxu3 %v868_v27 }
 0x10e   :  { %1648 = vmatpush.bf16.msrb.mxu1 %v2677_v34  ;;  %1674 = vmatpush.bf16.msrb.mxu3 %v2693_v45  ;;  %v1688_v45 = vand.u32 127, %v1687_v42 }
 0x110   :  { %vm1689_vm0 = vcmp.lt.s32.totalorder %v1688_v45, 4 }
 0x112   :  { %1649 = vmatpush.bf16.msrb.mxu1 %v2676_v36  ;;  %1675 = vmatpush.bf16.msrb.mxu3 %v2692_v50 }
 0x116   :  { %1650 = vmatpush.bf16.msrb.mxu1 %v2675_v38  ;;  %1676 = vmatpush.bf16.msrb.mxu3 %v2691_v57 }
 0x11a   :  { %1651 = vmatpush.bf16.msrb.mxu1 %v2674_v41  ;;  %1677 = vmatpush.bf16.msrb.mxu3 %v2690_v60  ;;  %v2707_v41 = vld [vmem:[%s3007_s6] ss:$0 sm:$0xff]  ;;  %s2902_s6 = smov [#allocation13]  }
 0x11b   :  { %s1719_s10 = sshll.u32 %s2902_s6, 4  ;;  %s1720_s10 = int_to_ptr.vmem [resolvable:$true] %s1719_s10 }
 0x11d   :  { %1336 = vmatmul.bf16.vlgmr.msra.gmra.mxu1 %v868_v27  ;;  %1362 = vmatmul.bf16.vlgmr.msra.gmra.mxu3 %v868_v27 }
 0x11e   :  { %1652 = vmatpush.bf16.msrb.mxu1 %v2673_v44  ;;  %1678 = vmatpush.bf16.msrb.mxu3 %v2689_v63 }
 0x122   :  { %1653 = vmatpush.bf16.msrb.mxu1 %v2672_v49  ;;  %1679 = vmatpush.bf16.msrb.mxu3 %v2688_v1 }
 0x126   :  { %1654 = vmatpush.bf16.msrb.mxu1 %v2671_v55  ;;  %1680 = vmatpush.bf16.msrb.mxu3 %v2687_v58 }
 0x12a   :  { %1655 = vmatpush.bf16.msrb.mxu1 %v2670_v56  ;;  %1681 = vmatpush.bf16.msrb.mxu3 %v2686_v5 }
 0x162   :  { %v1272_v46 = vpop.f32.mrf.mxu0 }
 0x163   :  { %v1273_v12 = vadd.f32 %v1272_v46, %v935_v11 }
 0x168   :  { %v1298_v51 = vpop.f32.mrf.mxu2 }
 0x169   :  { %v1299_v33 = vadd.f32 %v1298_v51, %v936_v13 }
 0x16a   :  { %v1274_v54 = vpop.f32.mrf.mxu0 }
 0x170   :  { %v1300_v61 = vpop.f32.mrf.mxu2 }
 0x172   :  { %v1324_v62 = vpop.f32.mrf.mxu0 }
 0x173   :  { %v1325_v23 = vadd.f32 %v1324_v62, %v937_v20 }
 0x178   :  { %v1350_v2 = vpop.f32.mrf.mxu2 }
 0x179   :  { %v1351_v27 = vadd.f32 %v1350_v2, %v938_v24 }
 0x17a   :  { %v1326_v6 = vpop.f32.mrf.mxu0 }
 0x180   :  { %v1352_v10 = vpop.f32.mrf.mxu2 }
 0x18a   :  { %v1285_v17 = vpop.f32.mrf.mxu1 }
 0x18b   :  { %v1286_v29 = vadd.f32 %v1285_v17, %v1273_v12 }
 0x18d   :  { %v1367_v14 = vmax.f32 %v1286_v29, 0.0 }
 0x18f   :  { %v1371_v15 = vpack.c.bf16 %v1367_v14, %v1367_v14 }
 0x190   :  { %v1311_v8 = vpop.f32.mrf.mxu3 }
 0x191   :  { %v1312_v16 = vadd.f32 %v1311_v8, %v1299_v33  ;;  %1643 = vmatmul.bf16.vlgmr.msrb.gmra.mxu0 %v1371_v15 }
 0x192   :  { %v1287_v18 = vpop.f32.mrf.mxu1 }
 0x193   :  { %v1368_v19 = vmax.f32 %v1312_v16, 0.0 }
 0x195   :  { %v1372_v21 = vpack.c.bf16 %v1368_v19, %v1368_v19 }
 0x197   :  { %1656 = vmatmul.bf16.vlgmr.msrb.gmra.mxu1 %v1372_v21 }
 0x198   :  { %v1313_v22 = vpop.f32.mrf.mxu3 }
 0x19a   :  { %v1337_v7 = vpop.f32.mrf.mxu1 }
 0x19b   :  { %v1338_v25 = vadd.f32 %v1337_v7, %v1325_v23 }
 0x19d   :  { %v1369_v26 = vmax.f32 %v1338_v25, 0.0 }
 0x19f   :  { %v1373_v28 = vpack.c.bf16 %v1369_v26, %v1369_v26 }
 0x1a0   :  { %v1363_v30 = vpop.f32.mrf.mxu3 }
 0x1a1   :  { %v1364_v31 = vadd.f32 %v1363_v30, %v1351_v27  ;;  %1669 = vmatmul.bf16.vlgmr.msrb.gmra.mxu2 %v1373_v28 }
 0x1a2   :  { %v1339_v32 = vpop.f32.mrf.mxu1 }
 0x1a3   :  { %v1370_v34 = vmax.f32 %v1364_v31, 0.0 }
 0x1a5   :  { %v1374_v35 = vpack.c.bf16 %v1370_v34, %v1370_v34 }
 0x1a7   :  { %1682 = vmatmul.bf16.vlgmr.msrb.gmra.mxu3 %v1374_v35 }
 0x1a8   :  { %v1365_v36 = vpop.f32.mrf.mxu3 }
 0x20e   :  { %v1644_v37 = vpop.f32.mrf.mxu0 }
 0x20f   :  { %v1645_v44 = vadd.f32 %v2707_v41, %v1644_v37 }
 0x214   :  { %v1657_v38 = vpop.f32.mrf.mxu1 }
 0x215   :  { %v1658_v46 = vadd.f32 %v1657_v38, %v1645_v44 }
 0x216   :  { %v1646_v39 = vpop.f32.mrf.mxu0 }
 0x21c   :  { %v1659_v40 = vpop.f32.mrf.mxu1 }
 0x224   :  { %v1670_v43 = vpop.f32.mrf.mxu2 }
 0x225   :  { %v1671_v47 = vadd.f32 %v1670_v43, %v1658_v46 }
 0x22a   :  { %v1683_v48 = vpop.f32.mrf.mxu3 }
 0x22b   :  { %v1684_v49 = vadd.f32 %v1683_v48, %v1671_v47 }
 0x22c   :  { %v1672_v50 = vpop.f32.mrf.mxu2 }
 0x22d   :  { %v1690_v51 = vsel %vm1689_vm0, %v1684_v49, -1e+30 }
 0x22e   :  { %1691 = vmax.xlane.f32.xlu0 %v1690_v51 }
 0x232   :  { %v1685_v52 = vpop.f32.mrf.mxu3 }
 0x2a1   :  { %v1692_v53 = vpop.xlane.xlu0 %1691 }
 0x2a2   :  { %v1693_v54 = vsub.f32 %v1690_v51, %v1692_v53 }
 0x2a4   :  { %v1694_v55 = vmul.f32 1.442695, %v1693_v54 }
 0x2a6   :  { %2708 = vpow2.f32 %v1694_v55 }
 0x2ac   :  { %v2709_v57 = vpop.eup %2708 }
 0x2ad   :  { %1696 = vadd.xlane.f32.xlu0 %v2709_v57 }
 0x320   :  { %v1697_v59 = vpop.xlane.xlu0 %1696 }
 0x321   :  { %2710 = vrcp.f32 %v1697_v59  ;;  %v1709_v4 = vand.u32 2147483648, %v1697_v59  ;;  %v1707_v63 = vand.u32 2147483647, %v1697_v59  ;;  %vm1703_vm2 = vweird.f32 %v1697_v59 }
 0x323   :  { %v1710_v1 = vor.u32 1.1754944e-38, %v1709_v4  ;;  %vm1708_vm4 = vcmp.eq.f32.partialorder %v1707_v63, 8.507059e+37 }
 0x327   :  { %v2711_v56 = vpop.eup %2710 }
 0x328   :  { %v1699_v60 = vmul.f32 %v2711_v56, %v1697_v59  ;;  %vm1704_vm1 = vweird.f32 %v2711_v56 }
 0x329   :  { %vm1705_vm3 = vmor %vm1703_vm2, %vm1704_vm1 }
 0x32a   :  { %v1700_v61 = vsub.f32 1.0, %v1699_v60 }
 0x32c   :  { %v1701_v62 = vmul.f32 %v2711_v56, %v1700_v61 }
 0x32e   :  { %v1702_v0 = vadd.f32 %v2711_v56, %v1701_v62 }
 0x330   :  { %v1706_v2 = vsel %vm1705_vm3, %v2711_v56, %v1702_v0 }
 0x331   :  { %v1711_v3 = vsel %vm1708_vm4, %v1710_v1, %v1706_v2 }
 0x332   :  { %v1712_v6 = vmul.f32 %v2709_v57, %v1711_v3 }
 0x334   :  { %1713 = vst [vmem:[#allocation13] sm:$0xff] %v1712_v6 }
 0x335   :  { %1724 = dma.vmem_to_hbm [thread:$0]  %s1720_s10, 128, %s1722_s13, [#allocation4]  }
 0x336   :  { %2888 = dma.done.wait [#allocation4], 128  }
 0x337   :  { %2889 = vsyncadd [#allocation4], 4294967168 }
 0x338   :  { %1729 = vsyncpa [#allocation3], 1 }
 0x339   :  { %1730 = vsyncpa [#allocation6], 1 }
 0x33a   :  { %1731 = vsyncpa [#allocation9], 1 }
 0x33b   :  { %1732 = vsyncpa [#allocation12], 1 }
 0x33c   :  { %1733 = vsyncpa [#allocation4], 1 }

</bundles_post_ra>
